<compile_context>
chip_gen: v7x
topology: tpu7x:2x2x1
jax: 0.10.0
libtpu: 0.0.40
codegen_flags: <defaults>
</compile_context>

<pallas_src>
import functools

import jax
import jax.numpy as jnp
from jax.experimental import pallas as pl
from jax.experimental.pallas import tpu as pltpu

_IN = 2
_HID = 10
_SUBLANES = 8
_CHUNK_LANES = 256                       # (8, 256) f32 slab = 2 vregs
_GRAIN = _SUBLANES * _CHUNK_LANES        # 2048 batch elements per chunk


def _mlp_kernel(x_ref, w1_ref, b1_ref, w2_ref, b2_ref, w3_ref, b3_ref, o_ref):
    """x_ref: (2, cpt, 8, 256) VMEM; o_ref: (cpt, 8, 256) VMEM.

    Weight/bias refs are flat f32 arrays in SMEM, flattened row-major from the
    PyTorch (out_features, in_features) layout.
    """
    chunks_per_tile = x_ref.shape[1]

    @pl.loop(0, chunks_per_tile)
    def _(c):
        x0 = x_ref[0, c]                        # (8, 256) slab of feature 0
        x1 = x_ref[1, c]                        # (8, 256) slab of feature 1

        # Layers 1+2 fused, k-outer: build h1[k] and immediately scatter it
        # into the 10 layer-2 accumulators (keeps register liveness low).
        acc2 = [None] * _HID
        for k in range(_HID):
            h1k = jnp.maximum(
                w1_ref[_IN * k] * x0 + w1_ref[_IN * k + 1] * x1 + b1_ref[k],
                0.0)
            for o in range(_HID):
                t = w2_ref[_HID * o + k] * h1k
                acc2[o] = t if k == 0 else acc2[o] + t

        # Layer-2 bias/ReLU + layer 3, consuming each h2[o] as it is made.
        y = None
        for o in range(_HID):
            h2o = jnp.maximum(acc2[o] + b2_ref[o], 0.0)
            t = w3_ref[o] * h2o
            y = t if o == 0 else y + t

        o_ref[c] = (y + b3_ref[0]).astype(o_ref.dtype)


def circle_model_forward_planar(x_planar, params, *, chunks_per_tile):
    """x_planar: (2, n_chunks, 8, 256) f32 -> (n_chunks, 8, 256) f32 logits."""
    w1, b1, w2, b2, w3, b3 = params
    _, n_chunks, _, _ = x_planar.shape
    assert n_chunks % chunks_per_tile == 0
    num_tiles = n_chunks // chunks_per_tile

    smem = pl.BlockSpec(memory_space=pltpu.MemorySpace.SMEM)

    # Double-buffered x + out tiles in f32, with 2x headroom; even a 128K-elem
    # tile is only ~6 MiB, so this stays well inside v7x's 64 MiB VMEM.
    tile_elems = chunks_per_tile * _GRAIN
    vmem_limit = int(min(64 * 2**20, max(32 * 2**20, 48 * tile_elems)))

    return pl.pallas_call(
        _mlp_kernel,
        out_shape=jax.ShapeDtypeStruct(
            (n_chunks, _SUBLANES, _CHUNK_LANES), jnp.float32),
        grid=(num_tiles,),
        in_specs=[
            pl.BlockSpec((2, chunks_per_tile, _SUBLANES, _CHUNK_LANES),
                         lambda i: (0, i, 0, 0)),
            smem, smem, smem, smem, smem, smem,
        ],
        out_specs=pl.BlockSpec((chunks_per_tile, _SUBLANES, _CHUNK_LANES),
                               lambda i: (i, 0, 0)),
        compiler_params=pltpu.CompilerParams(
            dimension_semantics=("parallel",),
            vmem_limit_bytes=vmem_limit),
    )(x_planar, w1, b1, w2, b2, w3, b3)


@functools.partial(jax.jit, static_argnames=("n_tile",))
def circle_model_forward(x, params, *, n_tile=131072):
    """x: (N, 2) float32 -> (N, 1) float32 logits (same semantics as the module)."""
    n = x.shape[0]

    # Round the tile to the chunk grain, and clamp it so the grid has >= 2
    # tiles whenever the batch is big enough (v7x dual-TC grid sharding).
    n_tile = max(_GRAIN, (n_tile // _GRAIN) * _GRAIN)
    half = pl.cdiv(pl.cdiv(n, 2), _GRAIN) * _GRAIN
    n_tile = min(n_tile, max(_GRAIN, half))
    n_pad = pl.cdiv(n, n_tile) * n_tile

    # One fused (under jit) pad + transpose + contiguous reshape into the
    # planar (2, n_chunks, 8, 256) layout.
    xt = (jnp.zeros((2, n_pad), x.dtype)
          .at[:, :n].set(x.T)
          .reshape(2, n_pad // _GRAIN, _SUBLANES, _CHUNK_LANES))

    out_planar = circle_model_forward_planar(
        xt, params, chunks_per_tile=n_tile // _GRAIN)

    # Invert the planar layout and drop the padded batch rows.
    return out_planar.reshape(n_pad)[:n].reshape(n, 1)


def init_params(key):
    """nn.Linear-style init (uniform +-1/sqrt(fan_in)); weights stored flat,
    row-major from the PyTorch (out_features, in_features) layout."""
    ks = jax.random.split(key, 6)

    def unif(k, shape, fan_in):
        bound = 1.0 / jnp.sqrt(jnp.float32(fan_in))
        return jax.random.uniform(k, shape, jnp.float32, -bound, bound)

    w1 = unif(ks[0], (_HID, _IN), _IN).reshape(-1)      # (20,)
    b1 = unif(ks[1], (_HID,), _IN)                      # (10,)
    w2 = unif(ks[2], (_HID, _HID), _HID).reshape(-1)    # (100,)
    b2 = unif(ks[3], (_HID,), _HID)                     # (10,)
    w3 = unif(ks[4], (1, _HID), _HID).reshape(-1)       # (10,)
    b3 = unif(ks[5], (1,), _HID)                        # (1,)
    return (w1, b1, w2, b2, w3, b3)


def reference_forward(x, params):
    w1, b1, w2, b2, w3, b3 = params
    W1 = w1.reshape(_HID, _IN)
    W2 = w2.reshape(_HID, _HID)
    W3 = w3.reshape(1, _HID)
    mm = lambda a, b: jnp.dot(a, b, precision=jax.lax.Precision.HIGHEST)
    h1 = jnp.maximum(mm(x, W1.T) + b1, 0.0)
    h2 = jnp.maximum(mm(h1, W2.T) + b2, 0.0)
    return mm(h2, W3.T) + b3


if __name__ == "__main__":
    key = jax.random.PRNGKey(0)
    pkey, xkey = jax.random.split(key)
    params = init_params(pkey)

    # Small batch of 2-D "circle" points.  N=5000 with n_tile=4096 exercises a
    # 2-tile parallel grid, a multi-chunk in-kernel loop, and the pad/slice path.
    x = jax.random.normal(xkey, (5000, 2), dtype=jnp.float32)

    out = jax.block_until_ready(circle_model_forward(x, params, n_tile=4096))
    ref = reference_forward(x, params)

    assert out.shape == (5000, 1)
    assert jnp.allclose(out, ref, atol=1e-5, rtol=1e-5)

    print("KERNEL_OK")
</pallas_src>

<mosaic_0001>
module attributes {stable_mosaic.version = 11 : i64} {
  func.func @_mlp_kernel(%arg0: i32, %arg1: memref<2x2x8x256xf32, #tpu.memory_space<vmem>>, %arg2: memref<20xf32, #tpu.memory_space<smem>>, %arg3: memref<10xf32, #tpu.memory_space<smem>>, %arg4: memref<100xf32, #tpu.memory_space<smem>>, %arg5: memref<10xf32, #tpu.memory_space<smem>>, %arg6: memref<10xf32, #tpu.memory_space<smem>>, %arg7: memref<1xf32, #tpu.memory_space<smem>>, %arg8: memref<2x8x256xf32, #tpu.memory_space<vmem>>) attributes {dimension_semantics = [#tpu.dimension_semantics<parallel>], iteration_bounds = array<i64: 2>, scalar_prefetch = 0 : i64, scratch_operands = 0 : i64, tpu.core_type = #tpu.core_type<tc>, window_params = [{transform_indices = @transform_0, window_bounds = array<i64: 2, 2, 8, 256>}, {transform_indices = @transform_1, window_bounds = array<i64: 20>}, {transform_indices = @transform_2, window_bounds = array<i64: 10>}, {transform_indices = @transform_3, window_bounds = array<i64: 100>}, {transform_indices = @transform_4, window_bounds = array<i64: 10>}, {transform_indices = @transform_5, window_bounds = array<i64: 10>}, {transform_indices = @transform_6, window_bounds = array<i64: 1>}, {transform_indices = @transform_7, window_bounds = array<i64: 2, 8, 256>}]} {
    %c0_i32 = arith.constant 0 : i32
    %c2_i32 = arith.constant 2 : i32
    %0 = arith.addi %c0_i32, %c2_i32 : i32
    %c1_i32 = arith.constant 1 : i32
    scf.for %arg9 = %c0_i32 to %0 step %c1_i32  : i32 {
      %c1_i32_1 = arith.constant 1 : i32
      %1 = arith.muli %arg9, %c1_i32_1 : i32
      %c0_i32_2 = arith.constant 0 : i32
      %2 = arith.addi %c0_i32_2, %1 : i32
      %c0 = arith.constant 0 : index
      %3 = arith.index_cast %2 : i32 to index
      %c0_3 = arith.constant 0 : index
      %c0_4 = arith.constant 0 : index
      %4 = vector.load %arg1[%c0, %3, %c0_3, %c0_4] : memref<2x2x8x256xf32, #tpu.memory_space<vmem>>, vector<1x1x8x256xf32>
      %5 = vector.shape_cast %4 : vector<1x1x8x256xf32> to vector<8x256xf32>
      %c1 = arith.constant 1 : index
      %6 = arith.index_cast %2 : i32 to index
      %c0_5 = arith.constant 0 : index
      %c0_6 = arith.constant 0 : index
      %7 = vector.load %arg1[%c1, %6, %c0_5, %c0_6] : memref<2x2x8x256xf32, #tpu.memory_space<vmem>>, vector<1x1x8x256xf32>
      %8 = vector.shape_cast %7 : vector<1x1x8x256xf32> to vector<8x256xf32>
      %c0_7 = arith.constant 0 : index
      %9 = memref.load %arg2[%c0_7] : memref<20xf32, #tpu.memory_space<smem>>
      %10 = vector.broadcast %9 : f32 to vector<8x256xf32>
      %11 = arith.mulf %10, %5 : vector<8x256xf32>
      %c1_8 = arith.constant 1 : index
      %12 = memref.load %arg2[%c1_8] : memref<20xf32, #tpu.memory_space<smem>>
      %13 = vector.broadcast %12 : f32 to vector<8x256xf32>
      %14 = arith.mulf %13, %8 : vector<8x256xf32>
      %15 = arith.addf %11, %14 : vector<8x256xf32>
      %c0_9 = arith.constant 0 : index
      %16 = memref.load %arg3[%c0_9] : memref<10xf32, #tpu.memory_space<smem>>
      %17 = vector.broadcast %16 : f32 to vector<8x256xf32>
      %18 = arith.addf %15, %17 : vector<8x256xf32>
      %cst = arith.constant 0.000000e+00 : f32
      %19 = vector.broadcast %cst : f32 to vector<8x256xf32>
      %20 = arith.maximumf %18, %19 : vector<8x256xf32>
      %c0_10 = arith.constant 0 : index
      %21 = memref.load %arg4[%c0_10] : memref<100xf32, #tpu.memory_space<smem>>
      %22 = vector.broadcast %21 : f32 to vector<8x256xf32>
      %23 = arith.mulf %22, %20 : vector<8x256xf32>
      %c10 = arith.constant 10 : index
      %24 = memref.load %arg4[%c10] : memref<100xf32, #tpu.memory_space<smem>>
      %25 = vector.broadcast %24 : f32 to vector<8x256xf32>
      %26 = arith.mulf %25, %20 : vector<8x256xf32>
      %c20 = arith.constant 20 : index
      %27 = memref.load %arg4[%c20] : memref<100xf32, #tpu.memory_space<smem>>
      %28 = vector.broadcast %27 : f32 to vector<8x256xf32>
      %29 = arith.mulf %28, %20 : vector<8x256xf32>
      %c30 = arith.constant 30 : index
      %30 = memref.load %arg4[%c30] : memref<100xf32, #tpu.memory_space<smem>>
      %31 = vector.broadcast %30 : f32 to vector<8x256xf32>
      %32 = arith.mulf %31, %20 : vector<8x256xf32>
      %c40 = arith.constant 40 : index
      %33 = memref.load %arg4[%c40] : memref<100xf32, #tpu.memory_space<smem>>
      %34 = vector.broadcast %33 : f32 to vector<8x256xf32>
      %35 = arith.mulf %34, %20 : vector<8x256xf32>
      %c50 = arith.constant 50 : index
      %36 = memref.load %arg4[%c50] : memref<100xf32, #tpu.memory_space<smem>>
      %37 = vector.broadcast %36 : f32 to vector<8x256xf32>
      %38 = arith.mulf %37, %20 : vector<8x256xf32>
      %c60 = arith.constant 60 : index
      %39 = memref.load %arg4[%c60] : memref<100xf32, #tpu.memory_space<smem>>
      %40 = vector.broadcast %39 : f32 to vector<8x256xf32>
      %41 = arith.mulf %40, %20 : vector<8x256xf32>
      %c70 = arith.constant 70 : index
      %42 = memref.load %arg4[%c70] : memref<100xf32, #tpu.memory_space<smem>>
      %43 = vector.broadcast %42 : f32 to vector<8x256xf32>
      %44 = arith.mulf %43, %20 : vector<8x256xf32>
      %c80 = arith.constant 80 : index
      %45 = memref.load %arg4[%c80] : memref<100xf32, #tpu.memory_space<smem>>
      %46 = vector.broadcast %45 : f32 to vector<8x256xf32>
      %47 = arith.mulf %46, %20 : vector<8x256xf32>
      %c90 = arith.constant 90 : index
      %48 = memref.load %arg4[%c90] : memref<100xf32, #tpu.memory_space<smem>>
      %49 = vector.broadcast %48 : f32 to vector<8x256xf32>
      %50 = arith.mulf %49, %20 : vector<8x256xf32>
      %c2 = arith.constant 2 : index
      %51 = memref.load %arg2[%c2] : memref<20xf32, #tpu.memory_space<smem>>
      %52 = vector.broadcast %51 : f32 to vector<8x256xf32>
      %53 = arith.mulf %52, %5 : vector<8x256xf32>
      %c3 = arith.constant 3 : index
      %54 = memref.load %arg2[%c3] : memref<20xf32, #tpu.memory_space<smem>>
      %55 = vector.broadcast %54 : f32 to vector<8x256xf32>
      %56 = arith.mulf %55, %8 : vector<8x256xf32>
      %57 = arith.addf %53, %56 : vector<8x256xf32>
      %c1_11 = arith.constant 1 : index
      %58 = memref.load %arg3[%c1_11] : memref<10xf32, #tpu.memory_space<smem>>
      %59 = vector.broadcast %58 : f32 to vector<8x256xf32>
      %60 = arith.addf %57, %59 : vector<8x256xf32>
      %cst_12 = arith.constant 0.000000e+00 : f32
      %61 = vector.broadcast %cst_12 : f32 to vector<8x256xf32>
      %62 = arith.maximumf %60, %61 : vector<8x256xf32>
      %c1_13 = arith.constant 1 : index
      %63 = memref.load %arg4[%c1_13] : memref<100xf32, #tpu.memory_space<smem>>
      %64 = vector.broadcast %63 : f32 to vector<8x256xf32>
      %65 = arith.mulf %64, %62 : vector<8x256xf32>
      %66 = arith.addf %23, %65 : vector<8x256xf32>
      %c11 = arith.constant 11 : index
      %67 = memref.load %arg4[%c11] : memref<100xf32, #tpu.memory_space<smem>>
      %68 = vector.broadcast %67 : f32 to vector<8x256xf32>
      %69 = arith.mulf %68, %62 : vector<8x256xf32>
      %70 = arith.addf %26, %69 : vector<8x256xf32>
      %c21 = arith.constant 21 : index
      %71 = memref.load %arg4[%c21] : memref<100xf32, #tpu.memory_space<smem>>
      %72 = vector.broadcast %71 : f32 to vector<8x256xf32>
      %73 = arith.mulf %72, %62 : vector<8x256xf32>
      %74 = arith.addf %29, %73 : vector<8x256xf32>
      %c31 = arith.constant 31 : index
      %75 = memref.load %arg4[%c31] : memref<100xf32, #tpu.memory_space<smem>>
      %76 = vector.broadcast %75 : f32 to vector<8x256xf32>
      %77 = arith.mulf %76, %62 : vector<8x256xf32>
      %78 = arith.addf %32, %77 : vector<8x256xf32>
      %c41 = arith.constant 41 : index
      %79 = memref.load %arg4[%c41] : memref<100xf32, #tpu.memory_space<smem>>
      %80 = vector.broadcast %79 : f32 to vector<8x256xf32>
      %81 = arith.mulf %80, %62 : vector<8x256xf32>
      %82 = arith.addf %35, %81 : vector<8x256xf32>
      %c51 = arith.constant 51 : index
      %83 = memref.load %arg4[%c51] : memref<100xf32, #tpu.memory_space<smem>>
      %84 = vector.broadcast %83 : f32 to vector<8x256xf32>
      %85 = arith.mulf %84, %62 : vector<8x256xf32>
      %86 = arith.addf %38, %85 : vector<8x256xf32>
      %c61 = arith.constant 61 : index
      %87 = memref.load %arg4[%c61] : memref<100xf32, #tpu.memory_space<smem>>
      %88 = vector.broadcast %87 : f32 to vector<8x256xf32>
      %89 = arith.mulf %88, %62 : vector<8x256xf32>
      %90 = arith.addf %41, %89 : vector<8x256xf32>
      %c71 = arith.constant 71 : index
      %91 = memref.load %arg4[%c71] : memref<100xf32, #tpu.memory_space<smem>>
      %92 = vector.broadcast %91 : f32 to vector<8x256xf32>
      %93 = arith.mulf %92, %62 : vector<8x256xf32>
      %94 = arith.addf %44, %93 : vector<8x256xf32>
      %c81 = arith.constant 81 : index
      %95 = memref.load %arg4[%c81] : memref<100xf32, #tpu.memory_space<smem>>
      %96 = vector.broadcast %95 : f32 to vector<8x256xf32>
      %97 = arith.mulf %96, %62 : vector<8x256xf32>
      %98 = arith.addf %47, %97 : vector<8x256xf32>
      %c91 = arith.constant 91 : index
      %99 = memref.load %arg4[%c91] : memref<100xf32, #tpu.memory_space<smem>>
      %100 = vector.broadcast %99 : f32 to vector<8x256xf32>
      %101 = arith.mulf %100, %62 : vector<8x256xf32>
      %102 = arith.addf %50, %101 : vector<8x256xf32>
      %c4 = arith.constant 4 : index
      %103 = memref.load %arg2[%c4] : memref<20xf32, #tpu.memory_space<smem>>
      %104 = vector.broadcast %103 : f32 to vector<8x256xf32>
      %105 = arith.mulf %104, %5 : vector<8x256xf32>
      %c5 = arith.constant 5 : index
      %106 = memref.load %arg2[%c5] : memref<20xf32, #tpu.memory_space<smem>>
      %107 = vector.broadcast %106 : f32 to vector<8x256xf32>
      %108 = arith.mulf %107, %8 : vector<8x256xf32>
      %109 = arith.addf %105, %108 : vector<8x256xf32>
      %c2_14 = arith.constant 2 : index
      %110 = memref.load %arg3[%c2_14] : memref<10xf32, #tpu.memory_space<smem>>
      %111 = vector.broadcast %110 : f32 to vector<8x256xf32>
      %112 = arith.addf %109, %111 : vector<8x256xf32>
      %cst_15 = arith.constant 0.000000e+00 : f32
      %113 = vector.broadcast %cst_15 : f32 to vector<8x256xf32>
      %114 = arith.maximumf %112, %113 : vector<8x256xf32>
      %c2_16 = arith.constant 2 : index
      %115 = memref.load %arg4[%c2_16] : memref<100xf32, #tpu.memory_space<smem>>
      %116 = vector.broadcast %115 : f32 to vector<8x256xf32>
      %117 = arith.mulf %116, %114 : vector<8x256xf32>
      %118 = arith.addf %66, %117 : vector<8x256xf32>
      %c12 = arith.constant 12 : index
      %119 = memref.load %arg4[%c12] : memref<100xf32, #tpu.memory_space<smem>>
      %120 = vector.broadcast %119 : f32 to vector<8x256xf32>
      %121 = arith.mulf %120, %114 : vector<8x256xf32>
      %122 = arith.addf %70, %121 : vector<8x256xf32>
      %c22 = arith.constant 22 : index
      %123 = memref.load %arg4[%c22] : memref<100xf32, #tpu.memory_space<smem>>
      %124 = vector.broadcast %123 : f32 to vector<8x256xf32>
      %125 = arith.mulf %124, %114 : vector<8x256xf32>
      %126 = arith.addf %74, %125 : vector<8x256xf32>
      %c32 = arith.constant 32 : index
      %127 = memref.load %arg4[%c32] : memref<100xf32, #tpu.memory_space<smem>>
      %128 = vector.broadcast %127 : f32 to vector<8x256xf32>
      %129 = arith.mulf %128, %114 : vector<8x256xf32>
      %130 = arith.addf %78, %129 : vector<8x256xf32>
      %c42 = arith.constant 42 : index
      %131 = memref.load %arg4[%c42] : memref<100xf32, #tpu.memory_space<smem>>
      %132 = vector.broadcast %131 : f32 to vector<8x256xf32>
      %133 = arith.mulf %132, %114 : vector<8x256xf32>
      %134 = arith.addf %82, %133 : vector<8x256xf32>
      %c52 = arith.constant 52 : index
      %135 = memref.load %arg4[%c52] : memref<100xf32, #tpu.memory_space<smem>>
      %136 = vector.broadcast %135 : f32 to vector<8x256xf32>
      %137 = arith.mulf %136, %114 : vector<8x256xf32>
      %138 = arith.addf %86, %137 : vector<8x256xf32>
      %c62 = arith.constant 62 : index
      %139 = memref.load %arg4[%c62] : memref<100xf32, #tpu.memory_space<smem>>
      %140 = vector.broadcast %139 : f32 to vector<8x256xf32>
      %141 = arith.mulf %140, %114 : vector<8x256xf32>
      %142 = arith.addf %90, %141 : vector<8x256xf32>
      %c72 = arith.constant 72 : index
      %143 = memref.load %arg4[%c72] : memref<100xf32, #tpu.memory_space<smem>>
      %144 = vector.broadcast %143 : f32 to vector<8x256xf32>
      %145 = arith.mulf %144, %114 : vector<8x256xf32>
      %146 = arith.addf %94, %145 : vector<8x256xf32>
      %c82 = arith.constant 82 : index
      %147 = memref.load %arg4[%c82] : memref<100xf32, #tpu.memory_space<smem>>
      %148 = vector.broadcast %147 : f32 to vector<8x256xf32>
      %149 = arith.mulf %148, %114 : vector<8x256xf32>
      %150 = arith.addf %98, %149 : vector<8x256xf32>
      %c92 = arith.constant 92 : index
      %151 = memref.load %arg4[%c92] : memref<100xf32, #tpu.memory_space<smem>>
      %152 = vector.broadcast %151 : f32 to vector<8x256xf32>
      %153 = arith.mulf %152, %114 : vector<8x256xf32>
      %154 = arith.addf %102, %153 : vector<8x256xf32>
      %c6 = arith.constant 6 : index
      %155 = memref.load %arg2[%c6] : memref<20xf32, #tpu.memory_space<smem>>
      %156 = vector.broadcast %155 : f32 to vector<8x256xf32>
      %157 = arith.mulf %156, %5 : vector<8x256xf32>
      %c7 = arith.constant 7 : index
      %158 = memref.load %arg2[%c7] : memref<20xf32, #tpu.memory_space<smem>>
      %159 = vector.broadcast %158 : f32 to vector<8x256xf32>
      %160 = arith.mulf %159, %8 : vector<8x256xf32>
      %161 = arith.addf %157, %160 : vector<8x256xf32>
      %c3_17 = arith.constant 3 : index
      %162 = memref.load %arg3[%c3_17] : memref<10xf32, #tpu.memory_space<smem>>
      %163 = vector.broadcast %162 : f32 to vector<8x256xf32>
      %164 = arith.addf %161, %163 : vector<8x256xf32>
      %cst_18 = arith.constant 0.000000e+00 : f32
      %165 = vector.broadcast %cst_18 : f32 to vector<8x256xf32>
      %166 = arith.maximumf %164, %165 : vector<8x256xf32>
      %c3_19 = arith.constant 3 : index
      %167 = memref.load %arg4[%c3_19] : memref<100xf32, #tpu.memory_space<smem>>
      %168 = vector.broadcast %167 : f32 to vector<8x256xf32>
      %169 = arith.mulf %168, %166 : vector<8x256xf32>
      %170 = arith.addf %118, %169 : vector<8x256xf32>
      %c13 = arith.constant 13 : index
      %171 = memref.load %arg4[%c13] : memref<100xf32, #tpu.memory_space<smem>>
      %172 = vector.broadcast %171 : f32 to vector<8x256xf32>
      %173 = arith.mulf %172, %166 : vector<8x256xf32>
      %174 = arith.addf %122, %173 : vector<8x256xf32>
      %c23 = arith.constant 23 : index
      %175 = memref.load %arg4[%c23] : memref<100xf32, #tpu.memory_space<smem>>
      %176 = vector.broadcast %175 : f32 to vector<8x256xf32>
      %177 = arith.mulf %176, %166 : vector<8x256xf32>
      %178 = arith.addf %126, %177 : vector<8x256xf32>
      %c33 = arith.constant 33 : index
      %179 = memref.load %arg4[%c33] : memref<100xf32, #tpu.memory_space<smem>>
      %180 = vector.broadcast %179 : f32 to vector<8x256xf32>
      %181 = arith.mulf %180, %166 : vector<8x256xf32>
      %182 = arith.addf %130, %181 : vector<8x256xf32>
      %c43 = arith.constant 43 : index
      %183 = memref.load %arg4[%c43] : memref<100xf32, #tpu.memory_space<smem>>
      %184 = vector.broadcast %183 : f32 to vector<8x256xf32>
      %185 = arith.mulf %184, %166 : vector<8x256xf32>
      %186 = arith.addf %134, %185 : vector<8x256xf32>
      %c53 = arith.constant 53 : index
      %187 = memref.load %arg4[%c53] : memref<100xf32, #tpu.memory_space<smem>>
      %188 = vector.broadcast %187 : f32 to vector<8x256xf32>
      %189 = arith.mulf %188, %166 : vector<8x256xf32>
      %190 = arith.addf %138, %189 : vector<8x256xf32>
      %c63 = arith.constant 63 : index
      %191 = memref.load %arg4[%c63] : memref<100xf32, #tpu.memory_space<smem>>
      %192 = vector.broadcast %191 : f32 to vector<8x256xf32>
      %193 = arith.mulf %192, %166 : vector<8x256xf32>
      %194 = arith.addf %142, %193 : vector<8x256xf32>
      %c73 = arith.constant 73 : index
      %195 = memref.load %arg4[%c73] : memref<100xf32, #tpu.memory_space<smem>>
      %196 = vector.broadcast %195 : f32 to vector<8x256xf32>
      %197 = arith.mulf %196, %166 : vector<8x256xf32>
      %198 = arith.addf %146, %197 : vector<8x256xf32>
      %c83 = arith.constant 83 : index
      %199 = memref.load %arg4[%c83] : memref<100xf32, #tpu.memory_space<smem>>
      %200 = vector.broadcast %199 : f32 to vector<8x256xf32>
      %201 = arith.mulf %200, %166 : vector<8x256xf32>
      %202 = arith.addf %150, %201 : vector<8x256xf32>
      %c93 = arith.constant 93 : index
      %203 = memref.load %arg4[%c93] : memref<100xf32, #tpu.memory_space<smem>>
      %204 = vector.broadcast %203 : f32 to vector<8x256xf32>
      %205 = arith.mulf %204, %166 : vector<8x256xf32>
      %206 = arith.addf %154, %205 : vector<8x256xf32>
      %c8 = arith.constant 8 : index
      %207 = memref.load %arg2[%c8] : memref<20xf32, #tpu.memory_space<smem>>
      %208 = vector.broadcast %207 : f32 to vector<8x256xf32>
      %209 = arith.mulf %208, %5 : vector<8x256xf32>
      %c9 = arith.constant 9 : index
      %210 = memref.load %arg2[%c9] : memref<20xf32, #tpu.memory_space<smem>>
      %211 = vector.broadcast %210 : f32 to vector<8x256xf32>
      %212 = arith.mulf %211, %8 : vector<8x256xf32>
      %213 = arith.addf %209, %212 : vector<8x256xf32>
      %c4_20 = arith.constant 4 : index
      %214 = memref.load %arg3[%c4_20] : memref<10xf32, #tpu.memory_space<smem>>
      %215 = vector.broadcast %214 : f32 to vector<8x256xf32>
      %216 = arith.addf %213, %215 : vector<8x256xf32>
      %cst_21 = arith.constant 0.000000e+00 : f32
      %217 = vector.broadcast %cst_21 : f32 to vector<8x256xf32>
      %218 = arith.maximumf %216, %217 : vector<8x256xf32>
      %c4_22 = arith.constant 4 : index
      %219 = memref.load %arg4[%c4_22] : memref<100xf32, #tpu.memory_space<smem>>
      %220 = vector.broadcast %219 : f32 to vector<8x256xf32>
      %221 = arith.mulf %220, %218 : vector<8x256xf32>
      %222 = arith.addf %170, %221 : vector<8x256xf32>
      %c14 = arith.constant 14 : index
      %223 = memref.load %arg4[%c14] : memref<100xf32, #tpu.memory_space<smem>>
      %224 = vector.broadcast %223 : f32 to vector<8x256xf32>
      %225 = arith.mulf %224, %218 : vector<8x256xf32>
      %226 = arith.addf %174, %225 : vector<8x256xf32>
      %c24 = arith.constant 24 : index
      %227 = memref.load %arg4[%c24] : memref<100xf32, #tpu.memory_space<smem>>
      %228 = vector.broadcast %227 : f32 to vector<8x256xf32>
      %229 = arith.mulf %228, %218 : vector<8x256xf32>
      %230 = arith.addf %178, %229 : vector<8x256xf32>
      %c34 = arith.constant 34 : index
      %231 = memref.load %arg4[%c34] : memref<100xf32, #tpu.memory_space<smem>>
      %232 = vector.broadcast %231 : f32 to vector<8x256xf32>
      %233 = arith.mulf %232, %218 : vector<8x256xf32>
      %234 = arith.addf %182, %233 : vector<8x256xf32>
      %c44 = arith.constant 44 : index
      %235 = memref.load %arg4[%c44] : memref<100xf32, #tpu.memory_space<smem>>
      %236 = vector.broadcast %235 : f32 to vector<8x256xf32>
      %237 = arith.mulf %236, %218 : vector<8x256xf32>
      %238 = arith.addf %186, %237 : vector<8x256xf32>
      %c54 = arith.constant 54 : index
      %239 = memref.load %arg4[%c54] : memref<100xf32, #tpu.memory_space<smem>>
      %240 = vector.broadcast %239 : f32 to vector<8x256xf32>
      %241 = arith.mulf %240, %218 : vector<8x256xf32>
      %242 = arith.addf %190, %241 : vector<8x256xf32>
      %c64 = arith.constant 64 : index
      %243 = memref.load %arg4[%c64] : memref<100xf32, #tpu.memory_space<smem>>
      %244 = vector.broadcast %243 : f32 to vector<8x256xf32>
      %245 = arith.mulf %244, %218 : vector<8x256xf32>
      %246 = arith.addf %194, %245 : vector<8x256xf32>
      %c74 = arith.constant 74 : index
      %247 = memref.load %arg4[%c74] : memref<100xf32, #tpu.memory_space<smem>>
      %248 = vector.broadcast %247 : f32 to vector<8x256xf32>
      %249 = arith.mulf %248, %218 : vector<8x256xf32>
      %250 = arith.addf %198, %249 : vector<8x256xf32>
      %c84 = arith.constant 84 : index
      %251 = memref.load %arg4[%c84] : memref<100xf32, #tpu.memory_space<smem>>
      %252 = vector.broadcast %251 : f32 to vector<8x256xf32>
      %253 = arith.mulf %252, %218 : vector<8x256xf32>
      %254 = arith.addf %202, %253 : vector<8x256xf32>
      %c94 = arith.constant 94 : index
      %255 = memref.load %arg4[%c94] : memref<100xf32, #tpu.memory_space<smem>>
      %256 = vector.broadcast %255 : f32 to vector<8x256xf32>
      %257 = arith.mulf %256, %218 : vector<8x256xf32>
      %258 = arith.addf %206, %257 : vector<8x256xf32>
      %c10_23 = arith.constant 10 : index
      %259 = memref.load %arg2[%c10_23] : memref<20xf32, #tpu.memory_space<smem>>
      %260 = vector.broadcast %259 : f32 to vector<8x256xf32>
      %261 = arith.mulf %260, %5 : vector<8x256xf32>
      %c11_24 = arith.constant 11 : index
      %262 = memref.load %arg2[%c11_24] : memref<20xf32, #tpu.memory_space<smem>>
      %263 = vector.broadcast %262 : f32 to vector<8x256xf32>
      %264 = arith.mulf %263, %8 : vector<8x256xf32>
      %265 = arith.addf %261, %264 : vector<8x256xf32>
      %c5_25 = arith.constant 5 : index
      %266 = memref.load %arg3[%c5_25] : memref<10xf32, #tpu.memory_space<smem>>
      %267 = vector.broadcast %266 : f32 to vector<8x256xf32>
      %268 = arith.addf %265, %267 : vector<8x256xf32>
      %cst_26 = arith.constant 0.000000e+00 : f32
      %269 = vector.broadcast %cst_26 : f32 to vector<8x256xf32>
      %270 = arith.maximumf %268, %269 : vector<8x256xf32>
      %c5_27 = arith.constant 5 : index
      %271 = memref.load %arg4[%c5_27] : memref<100xf32, #tpu.memory_space<smem>>
      %272 = vector.broadcast %271 : f32 to vector<8x256xf32>
      %273 = arith.mulf %272, %270 : vector<8x256xf32>
      %274 = arith.addf %222, %273 : vector<8x256xf32>
      %c15 = arith.constant 15 : index
      %275 = memref.load %arg4[%c15] : memref<100xf32, #tpu.memory_space<smem>>
      %276 = vector.broadcast %275 : f32 to vector<8x256xf32>
      %277 = arith.mulf %276, %270 : vector<8x256xf32>
      %278 = arith.addf %226, %277 : vector<8x256xf32>
      %c25 = arith.constant 25 : index
      %279 = memref.load %arg4[%c25] : memref<100xf32, #tpu.memory_space<smem>>
      %280 = vector.broadcast %279 : f32 to vector<8x256xf32>
      %281 = arith.mulf %280, %270 : vector<8x256xf32>
      %282 = arith.addf %230, %281 : vector<8x256xf32>
      %c35 = arith.constant 35 : index
      %283 = memref.load %arg4[%c35] : memref<100xf32, #tpu.memory_space<smem>>
      %284 = vector.broadcast %283 : f32 to vector<8x256xf32>
      %285 = arith.mulf %284, %270 : vector<8x256xf32>
      %286 = arith.addf %234, %285 : vector<8x256xf32>
      %c45 = arith.constant 45 : index
      %287 = memref.load %arg4[%c45] : memref<100xf32, #tpu.memory_space<smem>>
      %288 = vector.broadcast %287 : f32 to vector<8x256xf32>
      %289 = arith.mulf %288, %270 : vector<8x256xf32>
      %290 = arith.addf %238, %289 : vector<8x256xf32>
      %c55 = arith.constant 55 : index
      %291 = memref.load %arg4[%c55] : memref<100xf32, #tpu.memory_space<smem>>
      %292 = vector.broadcast %291 : f32 to vector<8x256xf32>
      %293 = arith.mulf %292, %270 : vector<8x256xf32>
      %294 = arith.addf %242, %293 : vector<8x256xf32>
      %c65 = arith.constant 65 : index
      %295 = memref.load %arg4[%c65] : memref<100xf32, #tpu.memory_space<smem>>
      %296 = vector.broadcast %295 : f32 to vector<8x256xf32>
      %297 = arith.mulf %296, %270 : vector<8x256xf32>
      %298 = arith.addf %246, %297 : vector<8x256xf32>
      %c75 = arith.constant 75 : index
      %299 = memref.load %arg4[%c75] : memref<100xf32, #tpu.memory_space<smem>>
      %300 = vector.broadcast %299 : f32 to vector<8x256xf32>
      %301 = arith.mulf %300, %270 : vector<8x256xf32>
      %302 = arith.addf %250, %301 : vector<8x256xf32>
      %c85 = arith.constant 85 : index
      %303 = memref.load %arg4[%c85] : memref<100xf32, #tpu.memory_space<smem>>
      %304 = vector.broadcast %303 : f32 to vector<8x256xf32>
      %305 = arith.mulf %304, %270 : vector<8x256xf32>
      %306 = arith.addf %254, %305 : vector<8x256xf32>
      %c95 = arith.constant 95 : index
      %307 = memref.load %arg4[%c95] : memref<100xf32, #tpu.memory_space<smem>>
      %308 = vector.broadcast %307 : f32 to vector<8x256xf32>
      %309 = arith.mulf %308, %270 : vector<8x256xf32>
      %310 = arith.addf %258, %309 : vector<8x256xf32>
      %c12_28 = arith.constant 12 : index
      %311 = memref.load %arg2[%c12_28] : memref<20xf32, #tpu.memory_space<smem>>
      %312 = vector.broadcast %311 : f32 to vector<8x256xf32>
      %313 = arith.mulf %312, %5 : vector<8x256xf32>
      %c13_29 = arith.constant 13 : index
      %314 = memref.load %arg2[%c13_29] : memref<20xf32, #tpu.memory_space<smem>>
      %315 = vector.broadcast %314 : f32 to vector<8x256xf32>
      %316 = arith.mulf %315, %8 : vector<8x256xf32>
      %317 = arith.addf %313, %316 : vector<8x256xf32>
      %c6_30 = arith.constant 6 : index
      %318 = memref.load %arg3[%c6_30] : memref<10xf32, #tpu.memory_space<smem>>
      %319 = vector.broadcast %318 : f32 to vector<8x256xf32>
      %320 = arith.addf %317, %319 : vector<8x256xf32>
      %cst_31 = arith.constant 0.000000e+00 : f32
      %321 = vector.broadcast %cst_31 : f32 to vector<8x256xf32>
      %322 = arith.maximumf %320, %321 : vector<8x256xf32>
      %c6_32 = arith.constant 6 : index
      %323 = memref.load %arg4[%c6_32] : memref<100xf32, #tpu.memory_space<smem>>
      %324 = vector.broadcast %323 : f32 to vector<8x256xf32>
      %325 = arith.mulf %324, %322 : vector<8x256xf32>
      %326 = arith.addf %274, %325 : vector<8x256xf32>
      %c16 = arith.constant 16 : index
      %327 = memref.load %arg4[%c16] : memref<100xf32, #tpu.memory_space<smem>>
      %328 = vector.broadcast %327 : f32 to vector<8x256xf32>
      %329 = arith.mulf %328, %322 : vector<8x256xf32>
      %330 = arith.addf %278, %329 : vector<8x256xf32>
      %c26 = arith.constant 26 : index
      %331 = memref.load %arg4[%c26] : memref<100xf32, #tpu.memory_space<smem>>
      %332 = vector.broadcast %331 : f32 to vector<8x256xf32>
      %333 = arith.mulf %332, %322 : vector<8x256xf32>
      %334 = arith.addf %282, %333 : vector<8x256xf32>
      %c36 = arith.constant 36 : index
      %335 = memref.load %arg4[%c36] : memref<100xf32, #tpu.memory_space<smem>>
      %336 = vector.broadcast %335 : f32 to vector<8x256xf32>
      %337 = arith.mulf %336, %322 : vector<8x256xf32>
      %338 = arith.addf %286, %337 : vector<8x256xf32>
      %c46 = arith.constant 46 : index
      %339 = memref.load %arg4[%c46] : memref<100xf32, #tpu.memory_space<smem>>
      %340 = vector.broadcast %339 : f32 to vector<8x256xf32>
      %341 = arith.mulf %340, %322 : vector<8x256xf32>
      %342 = arith.addf %290, %341 : vector<8x256xf32>
      %c56 = arith.constant 56 : index
      %343 = memref.load %arg4[%c56] : memref<100xf32, #tpu.memory_space<smem>>
      %344 = vector.broadcast %343 : f32 to vector<8x256xf32>
      %345 = arith.mulf %344, %322 : vector<8x256xf32>
      %346 = arith.addf %294, %345 : vector<8x256xf32>
      %c66 = arith.constant 66 : index
      %347 = memref.load %arg4[%c66] : memref<100xf32, #tpu.memory_space<smem>>
      %348 = vector.broadcast %347 : f32 to vector<8x256xf32>
      %349 = arith.mulf %348, %322 : vector<8x256xf32>
      %350 = arith.addf %298, %349 : vector<8x256xf32>
      %c76 = arith.constant 76 : index
      %351 = memref.load %arg4[%c76] : memref<100xf32, #tpu.memory_space<smem>>
      %352 = vector.broadcast %351 : f32 to vector<8x256xf32>
      %353 = arith.mulf %352, %322 : vector<8x256xf32>
      %354 = arith.addf %302, %353 : vector<8x256xf32>
      %c86 = arith.constant 86 : index
      %355 = memref.load %arg4[%c86] : memref<100xf32, #tpu.memory_space<smem>>
      %356 = vector.broadcast %355 : f32 to vector<8x256xf32>
      %357 = arith.mulf %356, %322 : vector<8x256xf32>
      %358 = arith.addf %306, %357 : vector<8x256xf32>
      %c96 = arith.constant 96 : index
      %359 = memref.load %arg4[%c96] : memref<100xf32, #tpu.memory_space<smem>>
      %360 = vector.broadcast %359 : f32 to vector<8x256xf32>
      %361 = arith.mulf %360, %322 : vector<8x256xf32>
      %362 = arith.addf %310, %361 : vector<8x256xf32>
      %c14_33 = arith.constant 14 : index
      %363 = memref.load %arg2[%c14_33] : memref<20xf32, #tpu.memory_space<smem>>
      %364 = vector.broadcast %363 : f32 to vector<8x256xf32>
      %365 = arith.mulf %364, %5 : vector<8x256xf32>
      %c15_34 = arith.constant 15 : index
      %366 = memref.load %arg2[%c15_34] : memref<20xf32, #tpu.memory_space<smem>>
      %367 = vector.broadcast %366 : f32 to vector<8x256xf32>
      %368 = arith.mulf %367, %8 : vector<8x256xf32>
      %369 = arith.addf %365, %368 : vector<8x256xf32>
      %c7_35 = arith.constant 7 : index
      %370 = memref.load %arg3[%c7_35] : memref<10xf32, #tpu.memory_space<smem>>
      %371 = vector.broadcast %370 : f32 to vector<8x256xf32>
      %372 = arith.addf %369, %371 : vector<8x256xf32>
      %cst_36 = arith.constant 0.000000e+00 : f32
      %373 = vector.broadcast %cst_36 : f32 to vector<8x256xf32>
      %374 = arith.maximumf %372, %373 : vector<8x256xf32>
      %c7_37 = arith.constant 7 : index
      %375 = memref.load %arg4[%c7_37] : memref<100xf32, #tpu.memory_space<smem>>
      %376 = vector.broadcast %375 : f32 to vector<8x256xf32>
      %377 = arith.mulf %376, %374 : vector<8x256xf32>
      %378 = arith.addf %326, %377 : vector<8x256xf32>
      %c17 = arith.constant 17 : index
      %379 = memref.load %arg4[%c17] : memref<100xf32, #tpu.memory_space<smem>>
      %380 = vector.broadcast %379 : f32 to vector<8x256xf32>
      %381 = arith.mulf %380, %374 : vector<8x256xf32>
      %382 = arith.addf %330, %381 : vector<8x256xf32>
      %c27 = arith.constant 27 : index
      %383 = memref.load %arg4[%c27] : memref<100xf32, #tpu.memory_space<smem>>
      %384 = vector.broadcast %383 : f32 to vector<8x256xf32>
      %385 = arith.mulf %384, %374 : vector<8x256xf32>
      %386 = arith.addf %334, %385 : vector<8x256xf32>
      %c37 = arith.constant 37 : index
      %387 = memref.load %arg4[%c37] : memref<100xf32, #tpu.memory_space<smem>>
      %388 = vector.broadcast %387 : f32 to vector<8x256xf32>
      %389 = arith.mulf %388, %374 : vector<8x256xf32>
      %390 = arith.addf %338, %389 : vector<8x256xf32>
      %c47 = arith.constant 47 : index
      %391 = memref.load %arg4[%c47] : memref<100xf32, #tpu.memory_space<smem>>
      %392 = vector.broadcast %391 : f32 to vector<8x256xf32>
      %393 = arith.mulf %392, %374 : vector<8x256xf32>
      %394 = arith.addf %342, %393 : vector<8x256xf32>
      %c57 = arith.constant 57 : index
      %395 = memref.load %arg4[%c57] : memref<100xf32, #tpu.memory_space<smem>>
      %396 = vector.broadcast %395 : f32 to vector<8x256xf32>
      %397 = arith.mulf %396, %374 : vector<8x256xf32>
      %398 = arith.addf %346, %397 : vector<8x256xf32>
      %c67 = arith.constant 67 : index
      %399 = memref.load %arg4[%c67] : memref<100xf32, #tpu.memory_space<smem>>
      %400 = vector.broadcast %399 : f32 to vector<8x256xf32>
      %401 = arith.mulf %400, %374 : vector<8x256xf32>
      %402 = arith.addf %350, %401 : vector<8x256xf32>
      %c77 = arith.constant 77 : index
      %403 = memref.load %arg4[%c77] : memref<100xf32, #tpu.memory_space<smem>>
      %404 = vector.broadcast %403 : f32 to vector<8x256xf32>
      %405 = arith.mulf %404, %374 : vector<8x256xf32>
      %406 = arith.addf %354, %405 : vector<8x256xf32>
      %c87 = arith.constant 87 : index
      %407 = memref.load %arg4[%c87] : memref<100xf32, #tpu.memory_space<smem>>
      %408 = vector.broadcast %407 : f32 to vector<8x256xf32>
      %409 = arith.mulf %408, %374 : vector<8x256xf32>
      %410 = arith.addf %358, %409 : vector<8x256xf32>
      %c97 = arith.constant 97 : index
      %411 = memref.load %arg4[%c97] : memref<100xf32, #tpu.memory_space<smem>>
      %412 = vector.broadcast %411 : f32 to vector<8x256xf32>
      %413 = arith.mulf %412, %374 : vector<8x256xf32>
      %414 = arith.addf %362, %413 : vector<8x256xf32>
      %c16_38 = arith.constant 16 : index
      %415 = memref.load %arg2[%c16_38] : memref<20xf32, #tpu.memory_space<smem>>
      %416 = vector.broadcast %415 : f32 to vector<8x256xf32>
      %417 = arith.mulf %416, %5 : vector<8x256xf32>
      %c17_39 = arith.constant 17 : index
      %418 = memref.load %arg2[%c17_39] : memref<20xf32, #tpu.memory_space<smem>>
      %419 = vector.broadcast %418 : f32 to vector<8x256xf32>
      %420 = arith.mulf %419, %8 : vector<8x256xf32>
      %421 = arith.addf %417, %420 : vector<8x256xf32>
      %c8_40 = arith.constant 8 : index
      %422 = memref.load %arg3[%c8_40] : memref<10xf32, #tpu.memory_space<smem>>
      %423 = vector.broadcast %422 : f32 to vector<8x256xf32>
      %424 = arith.addf %421, %423 : vector<8x256xf32>
      %cst_41 = arith.constant 0.000000e+00 : f32
      %425 = vector.broadcast %cst_41 : f32 to vector<8x256xf32>
      %426 = arith.maximumf %424, %425 : vector<8x256xf32>
      %c8_42 = arith.constant 8 : index
      %427 = memref.load %arg4[%c8_42] : memref<100xf32, #tpu.memory_space<smem>>
      %428 = vector.broadcast %427 : f32 to vector<8x256xf32>
      %429 = arith.mulf %428, %426 : vector<8x256xf32>
      %430 = arith.addf %378, %429 : vector<8x256xf32>
      %c18 = arith.constant 18 : index
      %431 = memref.load %arg4[%c18] : memref<100xf32, #tpu.memory_space<smem>>
      %432 = vector.broadcast %431 : f32 to vector<8x256xf32>
      %433 = arith.mulf %432, %426 : vector<8x256xf32>
      %434 = arith.addf %382, %433 : vector<8x256xf32>
      %c28 = arith.constant 28 : index
      %435 = memref.load %arg4[%c28] : memref<100xf32, #tpu.memory_space<smem>>
      %436 = vector.broadcast %435 : f32 to vector<8x256xf32>
      %437 = arith.mulf %436, %426 : vector<8x256xf32>
      %438 = arith.addf %386, %437 : vector<8x256xf32>
      %c38 = arith.constant 38 : index
      %439 = memref.load %arg4[%c38] : memref<100xf32, #tpu.memory_space<smem>>
      %440 = vector.broadcast %439 : f32 to vector<8x256xf32>
      %441 = arith.mulf %440, %426 : vector<8x256xf32>
      %442 = arith.addf %390, %441 : vector<8x256xf32>
      %c48 = arith.constant 48 : index
      %443 = memref.load %arg4[%c48] : memref<100xf32, #tpu.memory_space<smem>>
      %444 = vector.broadcast %443 : f32 to vector<8x256xf32>
      %445 = arith.mulf %444, %426 : vector<8x256xf32>
      %446 = arith.addf %394, %445 : vector<8x256xf32>
      %c58 = arith.constant 58 : index
      %447 = memref.load %arg4[%c58] : memref<100xf32, #tpu.memory_space<smem>>
      %448 = vector.broadcast %447 : f32 to vector<8x256xf32>
      %449 = arith.mulf %448, %426 : vector<8x256xf32>
      %450 = arith.addf %398, %449 : vector<8x256xf32>
      %c68 = arith.constant 68 : index
      %451 = memref.load %arg4[%c68] : memref<100xf32, #tpu.memory_space<smem>>
      %452 = vector.broadcast %451 : f32 to vector<8x256xf32>
      %453 = arith.mulf %452, %426 : vector<8x256xf32>
      %454 = arith.addf %402, %453 : vector<8x256xf32>
      %c78 = arith.constant 78 : index
      %455 = memref.load %arg4[%c78] : memref<100xf32, #tpu.memory_space<smem>>
      %456 = vector.broadcast %455 : f32 to vector<8x256xf32>
      %457 = arith.mulf %456, %426 : vector<8x256xf32>
      %458 = arith.addf %406, %457 : vector<8x256xf32>
      %c88 = arith.constant 88 : index
      %459 = memref.load %arg4[%c88] : memref<100xf32, #tpu.memory_space<smem>>
      %460 = vector.broadcast %459 : f32 to vector<8x256xf32>
      %461 = arith.mulf %460, %426 : vector<8x256xf32>
      %462 = arith.addf %410, %461 : vector<8x256xf32>
      %c98 = arith.constant 98 : index
      %463 = memref.load %arg4[%c98] : memref<100xf32, #tpu.memory_space<smem>>
      %464 = vector.broadcast %463 : f32 to vector<8x256xf32>
      %465 = arith.mulf %464, %426 : vector<8x256xf32>
      %466 = arith.addf %414, %465 : vector<8x256xf32>
      %c18_43 = arith.constant 18 : index
      %467 = memref.load %arg2[%c18_43] : memref<20xf32, #tpu.memory_space<smem>>
      %468 = vector.broadcast %467 : f32 to vector<8x256xf32>
      %469 = arith.mulf %468, %5 : vector<8x256xf32>
      %c19 = arith.constant 19 : index
      %470 = memref.load %arg2[%c19] : memref<20xf32, #tpu.memory_space<smem>>
      %471 = vector.broadcast %470 : f32 to vector<8x256xf32>
      %472 = arith.mulf %471, %8 : vector<8x256xf32>
      %473 = arith.addf %469, %472 : vector<8x256xf32>
      %c9_44 = arith.constant 9 : index
      %474 = memref.load %arg3[%c9_44] : memref<10xf32, #tpu.memory_space<smem>>
      %475 = vector.broadcast %474 : f32 to vector<8x256xf32>
      %476 = arith.addf %473, %475 : vector<8x256xf32>
      %cst_45 = arith.constant 0.000000e+00 : f32
      %477 = vector.broadcast %cst_45 : f32 to vector<8x256xf32>
      %478 = arith.maximumf %476, %477 : vector<8x256xf32>
      %c9_46 = arith.constant 9 : index
      %479 = memref.load %arg4[%c9_46] : memref<100xf32, #tpu.memory_space<smem>>
      %480 = vector.broadcast %479 : f32 to vector<8x256xf32>
      %481 = arith.mulf %480, %478 : vector<8x256xf32>
      %482 = arith.addf %430, %481 : vector<8x256xf32>
      %c19_47 = arith.constant 19 : index
      %483 = memref.load %arg4[%c19_47] : memref<100xf32, #tpu.memory_space<smem>>
      %484 = vector.broadcast %483 : f32 to vector<8x256xf32>
      %485 = arith.mulf %484, %478 : vector<8x256xf32>
      %486 = arith.addf %434, %485 : vector<8x256xf32>
      %c29 = arith.constant 29 : index
      %487 = memref.load %arg4[%c29] : memref<100xf32, #tpu.memory_space<smem>>
      %488 = vector.broadcast %487 : f32 to vector<8x256xf32>
      %489 = arith.mulf %488, %478 : vector<8x256xf32>
      %490 = arith.addf %438, %489 : vector<8x256xf32>
      %c39 = arith.constant 39 : index
      %491 = memref.load %arg4[%c39] : memref<100xf32, #tpu.memory_space<smem>>
      %492 = vector.broadcast %491 : f32 to vector<8x256xf32>
      %493 = arith.mulf %492, %478 : vector<8x256xf32>
      %494 = arith.addf %442, %493 : vector<8x256xf32>
      %c49 = arith.constant 49 : index
      %495 = memref.load %arg4[%c49] : memref<100xf32, #tpu.memory_space<smem>>
      %496 = vector.broadcast %495 : f32 to vector<8x256xf32>
      %497 = arith.mulf %496, %478 : vector<8x256xf32>
      %498 = arith.addf %446, %497 : vector<8x256xf32>
      %c59 = arith.constant 59 : index
      %499 = memref.load %arg4[%c59] : memref<100xf32, #tpu.memory_space<smem>>
      %500 = vector.broadcast %499 : f32 to vector<8x256xf32>
      %501 = arith.mulf %500, %478 : vector<8x256xf32>
      %502 = arith.addf %450, %501 : vector<8x256xf32>
      %c69 = arith.constant 69 : index
      %503 = memref.load %arg4[%c69] : memref<100xf32, #tpu.memory_space<smem>>
      %504 = vector.broadcast %503 : f32 to vector<8x256xf32>
      %505 = arith.mulf %504, %478 : vector<8x256xf32>
      %506 = arith.addf %454, %505 : vector<8x256xf32>
      %c79 = arith.constant 79 : index
      %507 = memref.load %arg4[%c79] : memref<100xf32, #tpu.memory_space<smem>>
      %508 = vector.broadcast %507 : f32 to vector<8x256xf32>
      %509 = arith.mulf %508, %478 : vector<8x256xf32>
      %510 = arith.addf %458, %509 : vector<8x256xf32>
      %c89 = arith.constant 89 : index
      %511 = memref.load %arg4[%c89] : memref<100xf32, #tpu.memory_space<smem>>
      %512 = vector.broadcast %511 : f32 to vector<8x256xf32>
      %513 = arith.mulf %512, %478 : vector<8x256xf32>
      %514 = arith.addf %462, %513 : vector<8x256xf32>
      %c99 = arith.constant 99 : index
      %515 = memref.load %arg4[%c99] : memref<100xf32, #tpu.memory_space<smem>>
      %516 = vector.broadcast %515 : f32 to vector<8x256xf32>
      %517 = arith.mulf %516, %478 : vector<8x256xf32>
      %518 = arith.addf %466, %517 : vector<8x256xf32>
      %c0_48 = arith.constant 0 : index
      %519 = memref.load %arg5[%c0_48] : memref<10xf32, #tpu.memory_space<smem>>
      %520 = vector.broadcast %519 : f32 to vector<8x256xf32>
      %521 = arith.addf %482, %520 : vector<8x256xf32>
      %cst_49 = arith.constant 0.000000e+00 : f32
      %522 = vector.broadcast %cst_49 : f32 to vector<8x256xf32>
      %523 = arith.maximumf %521, %522 : vector<8x256xf32>
      %c0_50 = arith.constant 0 : index
      %524 = memref.load %arg6[%c0_50] : memref<10xf32, #tpu.memory_space<smem>>
      %525 = vector.broadcast %524 : f32 to vector<8x256xf32>
      %526 = arith.mulf %525, %523 : vector<8x256xf32>
      %c1_51 = arith.constant 1 : index
      %527 = memref.load %arg5[%c1_51] : memref<10xf32, #tpu.memory_space<smem>>
      %528 = vector.broadcast %527 : f32 to vector<8x256xf32>
      %529 = arith.addf %486, %528 : vector<8x256xf32>
      %cst_52 = arith.constant 0.000000e+00 : f32
      %530 = vector.broadcast %cst_52 : f32 to vector<8x256xf32>
      %531 = arith.maximumf %529, %530 : vector<8x256xf32>
      %c1_53 = arith.constant 1 : index
      %532 = memref.load %arg6[%c1_53] : memref<10xf32, #tpu.memory_space<smem>>
      %533 = vector.broadcast %532 : f32 to vector<8x256xf32>
      %534 = arith.mulf %533, %531 : vector<8x256xf32>
      %535 = arith.addf %526, %534 : vector<8x256xf32>
      %c2_54 = arith.constant 2 : index
      %536 = memref.load %arg5[%c2_54] : memref<10xf32, #tpu.memory_space<smem>>
      %537 = vector.broadcast %536 : f32 to vector<8x256xf32>
      %538 = arith.addf %490, %537 : vector<8x256xf32>
      %cst_55 = arith.constant 0.000000e+00 : f32
      %539 = vector.broadcast %cst_55 : f32 to vector<8x256xf32>
      %540 = arith.maximumf %538, %539 : vector<8x256xf32>
      %c2_56 = arith.constant 2 : index
      %541 = memref.load %arg6[%c2_56] : memref<10xf32, #tpu.memory_space<smem>>
      %542 = vector.broadcast %541 : f32 to vector<8x256xf32>
      %543 = arith.mulf %542, %540 : vector<8x256xf32>
      %544 = arith.addf %535, %543 : vector<8x256xf32>
      %c3_57 = arith.constant 3 : index
      %545 = memref.load %arg5[%c3_57] : memref<10xf32, #tpu.memory_space<smem>>
      %546 = vector.broadcast %545 : f32 to vector<8x256xf32>
      %547 = arith.addf %494, %546 : vector<8x256xf32>
      %cst_58 = arith.constant 0.000000e+00 : f32
      %548 = vector.broadcast %cst_58 : f32 to vector<8x256xf32>
      %549 = arith.maximumf %547, %548 : vector<8x256xf32>
      %c3_59 = arith.constant 3 : index
      %550 = memref.load %arg6[%c3_59] : memref<10xf32, #tpu.memory_space<smem>>
      %551 = vector.broadcast %550 : f32 to vector<8x256xf32>
      %552 = arith.mulf %551, %549 : vector<8x256xf32>
      %553 = arith.addf %544, %552 : vector<8x256xf32>
      %c4_60 = arith.constant 4 : index
      %554 = memref.load %arg5[%c4_60] : memref<10xf32, #tpu.memory_space<smem>>
      %555 = vector.broadcast %554 : f32 to vector<8x256xf32>
      %556 = arith.addf %498, %555 : vector<8x256xf32>
      %cst_61 = arith.constant 0.000000e+00 : f32
      %557 = vector.broadcast %cst_61 : f32 to vector<8x256xf32>
      %558 = arith.maximumf %556, %557 : vector<8x256xf32>
      %c4_62 = arith.constant 4 : index
      %559 = memref.load %arg6[%c4_62] : memref<10xf32, #tpu.memory_space<smem>>
      %560 = vector.broadcast %559 : f32 to vector<8x256xf32>
      %561 = arith.mulf %560, %558 : vector<8x256xf32>
      %562 = arith.addf %553, %561 : vector<8x256xf32>
      %c5_63 = arith.constant 5 : index
      %563 = memref.load %arg5[%c5_63] : memref<10xf32, #tpu.memory_space<smem>>
      %564 = vector.broadcast %563 : f32 to vector<8x256xf32>
      %565 = arith.addf %502, %564 : vector<8x256xf32>
      %cst_64 = arith.constant 0.000000e+00 : f32
      %566 = vector.broadcast %cst_64 : f32 to vector<8x256xf32>
      %567 = arith.maximumf %565, %566 : vector<8x256xf32>
      %c5_65 = arith.constant 5 : index
      %568 = memref.load %arg6[%c5_65] : memref<10xf32, #tpu.memory_space<smem>>
      %569 = vector.broadcast %568 : f32 to vector<8x256xf32>
      %570 = arith.mulf %569, %567 : vector<8x256xf32>
      %571 = arith.addf %562, %570 : vector<8x256xf32>
      %c6_66 = arith.constant 6 : index
      %572 = memref.load %arg5[%c6_66] : memref<10xf32, #tpu.memory_space<smem>>
      %573 = vector.broadcast %572 : f32 to vector<8x256xf32>
      %574 = arith.addf %506, %573 : vector<8x256xf32>
      %cst_67 = arith.constant 0.000000e+00 : f32
      %575 = vector.broadcast %cst_67 : f32 to vector<8x256xf32>
      %576 = arith.maximumf %574, %575 : vector<8x256xf32>
      %c6_68 = arith.constant 6 : index
      %577 = memref.load %arg6[%c6_68] : memref<10xf32, #tpu.memory_space<smem>>
      %578 = vector.broadcast %577 : f32 to vector<8x256xf32>
      %579 = arith.mulf %578, %576 : vector<8x256xf32>
      %580 = arith.addf %571, %579 : vector<8x256xf32>
      %c7_69 = arith.constant 7 : index
      %581 = memref.load %arg5[%c7_69] : memref<10xf32, #tpu.memory_space<smem>>
      %582 = vector.broadcast %581 : f32 to vector<8x256xf32>
      %583 = arith.addf %510, %582 : vector<8x256xf32>
      %cst_70 = arith.constant 0.000000e+00 : f32
      %584 = vector.broadcast %cst_70 : f32 to vector<8x256xf32>
      %585 = arith.maximumf %583, %584 : vector<8x256xf32>
      %c7_71 = arith.constant 7 : index
      %586 = memref.load %arg6[%c7_71] : memref<10xf32, #tpu.memory_space<smem>>
      %587 = vector.broadcast %586 : f32 to vector<8x256xf32>
      %588 = arith.mulf %587, %585 : vector<8x256xf32>
      %589 = arith.addf %580, %588 : vector<8x256xf32>
      %c8_72 = arith.constant 8 : index
      %590 = memref.load %arg5[%c8_72] : memref<10xf32, #tpu.memory_space<smem>>
      %591 = vector.broadcast %590 : f32 to vector<8x256xf32>
      %592 = arith.addf %514, %591 : vector<8x256xf32>
      %cst_73 = arith.constant 0.000000e+00 : f32
      %593 = vector.broadcast %cst_73 : f32 to vector<8x256xf32>
      %594 = arith.maximumf %592, %593 : vector<8x256xf32>
      %c8_74 = arith.constant 8 : index
      %595 = memref.load %arg6[%c8_74] : memref<10xf32, #tpu.memory_space<smem>>
      %596 = vector.broadcast %595 : f32 to vector<8x256xf32>
      %597 = arith.mulf %596, %594 : vector<8x256xf32>
      %598 = arith.addf %589, %597 : vector<8x256xf32>
      %c9_75 = arith.constant 9 : index
      %599 = memref.load %arg5[%c9_75] : memref<10xf32, #tpu.memory_space<smem>>
      %600 = vector.broadcast %599 : f32 to vector<8x256xf32>
      %601 = arith.addf %518, %600 : vector<8x256xf32>
      %cst_76 = arith.constant 0.000000e+00 : f32
      %602 = vector.broadcast %cst_76 : f32 to vector<8x256xf32>
      %603 = arith.maximumf %601, %602 : vector<8x256xf32>
      %c9_77 = arith.constant 9 : index
      %604 = memref.load %arg6[%c9_77] : memref<10xf32, #tpu.memory_space<smem>>
      %605 = vector.broadcast %604 : f32 to vector<8x256xf32>
      %606 = arith.mulf %605, %603 : vector<8x256xf32>
      %607 = arith.addf %598, %606 : vector<8x256xf32>
      %c0_78 = arith.constant 0 : index
      %608 = memref.load %arg7[%c0_78] : memref<1xf32, #tpu.memory_space<smem>>
      %609 = vector.broadcast %608 : f32 to vector<8x256xf32>
      %610 = arith.addf %607, %609 : vector<8x256xf32>
      %611 = arith.index_cast %2 : i32 to index
      %c0_79 = arith.constant 0 : index
      %c0_80 = arith.constant 0 : index
      %612 = vector.load %arg8[%611, %c0_79, %c0_80] : memref<2x8x256xf32, #tpu.memory_space<vmem>>, vector<1x8x256xf32>
      %613 = vector.shape_cast %612 : vector<1x8x256xf32> to vector<8x256xf32>
      %614 = vector.shape_cast %610 : vector<8x256xf32> to vector<1x8x256xf32>
      tpu.vector_store %arg8[%611, %c0_79, %c0_80], %614 {strides = array<i32>} : memref<2x8x256xf32, #tpu.memory_space<vmem>>, vector<1x8x256xf32>,
    }
    %c2_i32_0 = arith.constant 2 : i32
    return
  }
  func.func @transform_0(%arg0: i32) -> (i32, i32, i32, i32) {
    %c0_i32 = arith.constant 0 : i32
    %c0_i32_0 = arith.constant 0 : i32
    %c0_i32_1 = arith.constant 0 : i32
    %c0_i32_2 = arith.constant 0 : i32
    return %c0_i32, %arg0, %c0_i32_0, %c0_i32_1 : i32, i32, i32, i32
  }
  func.func @transform_1(%arg0: i32) -> i32 {
    %c0_i32 = arith.constant 0 : i32
    %c0_i32_0 = arith.constant 0 : i32
    return %c0_i32 : i32
  }
  func.func @transform_2(%arg0: i32) -> i32 {
    %c0_i32 = arith.constant 0 : i32
    %c0_i32_0 = arith.constant 0 : i32
    return %c0_i32 : i32
  }
  func.func @transform_3(%arg0: i32) -> i32 {
    %c0_i32 = arith.constant 0 : i32
    %c0_i32_0 = arith.constant 0 : i32
    return %c0_i32 : i32
  }
  func.func @transform_4(%arg0: i32) -> i32 {
    %c0_i32 = arith.constant 0 : i32
    %c0_i32_0 = arith.constant 0 : i32
    return %c0_i32 : i32
  }
  func.func @transform_5(%arg0: i32) -> i32 {
    %c0_i32 = arith.constant 0 : i32
    %c0_i32_0 = arith.constant 0 : i32
    return %c0_i32 : i32
  }
  func.func @transform_6(%arg0: i32) -> i32 {
    %c0_i32 = arith.constant 0 : i32
    %c0_i32_0 = arith.constant 0 : i32
    return %c0_i32 : i32
  }
  func.func @transform_7(%arg0: i32) -> (i32, i32, i32) {
    %c0_i32 = arith.constant 0 : i32
    %c0_i32_0 = arith.constant 0 : i32
    %c0_i32_1 = arith.constant 0 : i32
    return %arg0, %c0_i32, %c0_i32_0 : i32, i32, i32
  }
}

</mosaic_0001>

<bundles_post_ra>
// kernel: circle_model_forward.1
= control target key start
LH: loop header
LB: loop body
LE: loop exit
PB: predicated region body
PF: predicated region fallthrough
CT: control target
= control target key end

     0   :  { %s3067_s0 = inlined_call_operand.vmem [shape: f32[2,4,8,256], index: 0, kind: input, shape index: {}]   ;;  %s3068_s1 = inlined_call_operand.vmem [shape: f32[20], index: 1, kind: input, shape index: {}]   ;;  %s3069_s2 = inlined_call_operand.vmem [shape: f32[10], index: 2, kind: input, shape index: {}]   ;;  %s3070_s3 = inlined_call_operand.vmem [shape: f32[100], index: 3, kind: input, shape index: {}]   ;;  %s3071_s4 = inlined_call_operand.vmem [shape: f32[10], index: 4, kind: input, shape index: {}]   ;;  %s3072_s5 = inlined_call_operand.vmem [shape: f32[10], index: 5, kind: input, shape index: {}]   ;;  %s3073_s6 = inlined_call_operand.<no memory space> [shape: f32[1], index: 6, kind: input, shape index: {}]   ;;  %s3074_s7 = inlined_call_operand.vmem [shape: f32[4,8,256], index: 7, kind: output, shape index: {}]  }
   0x1   :  { %3079 = sst [smem:[#allocation15_spill]] %s3067_s0 }
   0x2   :  { %12 = sst [smem:[#allocation2]] %s3073_s6 }
   0x3   :  { %13 = vsyncpa [#allocation5], 0 }
   0x4   :  { %14 = vsyncpa [#allocation7], 0 }
   0x5   :  { %15 = vsyncpa [#allocation10], 0  ;;  %s1829_s26 = smov 0   ;;  %s1831_s27 = smov 0  }
   0x6   :  { %s1833_s28 = smov 0  }
   0x7 LB: > { %s1392_s6 = sadd.s32 4294967295, %s1775_s28   ;;  %s1846_s29 = sadd.s32 1, %s1775_s28   ;;  %s1775_s28 = sphi %s1833_s28, %s3093_s28   ;;  %s1771_s27 = sphi %s1831_s27, %s3092_s27   ;;  %s1767_s26 = sphi %s1829_s26, %s3091_s26  }
   0x8   : > { %s25_s30 = ssub.s32 %s1775_s28, %s1846_s29  ;;  %s28_s8 = sadd.s32 1, %s1771_s27 }
   0x9   : > { %p26_p0 = scmp.eq.s32.totalorder %s25_s30, 0  ;;  %p35_p1 = scmp.ne.s32.totalorder %s1771_s27, %s1767_s26 }
   0xa   : > { %p36_p2 = scmp.eq.s32.totalorder %s1775_s28, 0  ;;  %p1394_p3 = scmp.ge.s32.totalorder %s1775_s28, 1 }
   0xb   : > { %s1856_s9 = scalar_select %p26_p0, %s1771_s27, %s28_s8  }
   0xc   : > { %p1858_p4 = por %p36_p2, %p35_p1  ;;  %p204_p5 = scmp.lt.s32.totalorder %s1775_s28, 3 }
   0xd   : > { %p1865_p6 = scmp.eq.s32.totalorder %s1392_s6, 0  ;;  %s228_s15 = sshll.u32 %s3069_s2, 4  ;;  %s229_s15 = int_to_ptr.vmem [resolvable:$true] %s228_s15 }
   0xe   : > { %s3080_s10 = scalar_select %p1858_p4, 1, 0 }
   0xf   : > { %s3081_s11 = scalar_select %p1865_p6, 1, 0 }
  0x10   : > { %p1869_p7 = pnand %p1394_p3, %p204_p5  ;;  %s250_s18 = sshll.u32 %s3071_s4, 4  ;;  %s251_s18 = int_to_ptr.vmem [resolvable:$true] %s250_s18 }
  0x11   : > { %s217_s22 = sshll.u32 %s3068_s1, 4  ;;  %s239_s25 = sshll.u32 %s3070_s3, 4  ;;  %s1890_s22 = int_to_ptr.vmem [resolvable:$true] %s217_s22  ;;  %s240_s25 = int_to_ptr.vmem [resolvable:$true] %s239_s25 }
  0x12   : > { %s3082_s12 = scalar_select %p1869_p7, 1, 0 }
  0x13   : > { %p1595_p8 = pneg %p1869_p7  ;;  %s1662_s30 = scalar_lea.vmem %s229_s15, 16 }
  0x14   : > { %p1663_p10 = scmp.ne.s32.totalorder %s229_s15, %s1662_s30  ;;  %p1670_p0 = scmp.lt.s32.totalorder %s229_s15, %s229_s15 }
  0x15   : > { %p1883_p9 = pnand %p1865_p6, %p1595_p8  ;;  %p1671_p1 = scmp.lt.s32.totalorder %s1662_s30, %s1662_s30 }
  0x17   : > { %p1897_p11 = pneg %p1883_p9  ;;  %p1672_p2 = por %p1671_p1, %p1670_p0 }
  0x19   : > { %p1665_p12 = pnand %p1897_p11, %p1663_p10 }
  0x1b   : > { %p1666_p13 = pneg %p1665_p12 }
  0x1d   : > { %p1673_p3 = pnand %p1672_p2, %p1666_p13 }
  0x1f   : > { %1676 = shalt.err (!%p1673_p3)
}
  0x20   : > { %s1781_s13 = smov [#allocation6]   ;;  %s1677_s14 = scalar_lea.vmem %s251_s18, 16 }
  0x21   : > { %1601 = dma.vmem_to_smem (!%p1883_p9), %s229_s15, 16, %s1781_s13, [#allocation7]  }
  0x22   : > { %p1678_p5 = scmp.ne.s32.totalorder %s251_s18, %s1677_s14  ;;  %p1685_p7 = scmp.lt.s32.totalorder %s251_s18, %s251_s18 }
  0x23   : > { %p1686_p4 = scmp.lt.s32.totalorder %s1677_s14, %s1677_s14 }
  0x24   : > { %p1680_p8 = pnand %p1678_p5, %p1897_p11 }
  0x25   : > { %p1687_p10 = por %p1686_p4, %p1685_p7 }
  0x26   : > { %p1681_p6 = pneg %p1680_p8 }
  0x28   : > { %p1688_p12 = pnand %p1687_p10, %p1681_p6 }
  0x2a   : > { %1691 = shalt.err (!%p1688_p12)
}
  0x2b   : > { %s1782_s16 = smov [#allocation9]   ;;  %s1692_s17 = scalar_lea.vmem %s1890_s22, 16 }
  0x2c   : > { %1607 = dma.vmem_to_smem (!%p1883_p9), %s251_s18, 16, %s1782_s16, [#allocation10]  }
  0x2d   : > { %p1693_p13 = scmp.ne.s32.totalorder %s1890_s22, %s1692_s17  ;;  %p1700_p2 = scmp.lt.s32.totalorder %s1890_s22, %s1890_s22 }
  0x2e   : > { %p1701_p3 = scmp.lt.s32.totalorder %s1692_s17, %s1692_s17 }
  0x2f   : > { %p1695_p0 = pnand %p1693_p13, %p1897_p11 }
  0x30   : > { %p1702_p5 = por %p1701_p3, %p1700_p2 }
  0x31   : > { %p1696_p1 = pneg %p1695_p0 }
  0x33   : > { %p1703_p4 = pnand %p1702_p5, %p1696_p1 }
  0x35   : > { %1706 = shalt.err (!%p1703_p4)
}
  0x36   : > { %s1783_s15 = smov [#allocation4]   ;;  %s1707_s18 = scalar_lea.vmem %s240_s25, 16 }
  0x37   : > { %1598 = dma.vmem_to_smem (!%p1883_p9), %s1890_s22, 16, %s1783_s15, [#allocation5]  }
  0x38   : > { %p1708_p6 = scmp.ne.s32.totalorder %s240_s25, %s1707_s18  ;;  %p1715_p10 = scmp.lt.s32.totalorder %s240_s25, %s240_s25 }
  0x39   : > { %p1716_p12 = scmp.lt.s32.totalorder %s1707_s18, %s1707_s18 }
  0x3a   : > { %p1710_p7 = pnand %p1708_p6, %p1897_p11 }
  0x3b   : > { %p1717_p13 = por %p1716_p12, %p1715_p10 }
  0x3c   : > { %p1711_p8 = pneg %p1710_p7 }
  0x3e   : > { %p1718_p0 = pnand %p1717_p13, %p1711_p8 }
  0x40   : > { %1721 = shalt.err (!%p1718_p0)
}
  0x41   : > { %s1784_s23 = smov [#allocation8]   ;;  %s261_s30 = sshll.u32 %s3072_s5, 4  ;;  %s262_s30 = int_to_ptr.vmem [resolvable:$true] %s261_s30 }
  0x42   : > { %1604 = dma.vmem_to_smem (!%p1883_p9), %s240_s25, 16, %s1784_s23, [#allocation7]  }
  0x43   : > { %s1722_s13 = scalar_lea.vmem %s262_s30, 16  ;;  %p1730_p5 = scmp.lt.s32.totalorder %s262_s30, %s262_s30 }
  0x44   : > { %p1723_p1 = scmp.ne.s32.totalorder %s262_s30, %s1722_s13  ;;  %p1731_p4 = scmp.lt.s32.totalorder %s1722_s13, %s1722_s13 }
  0x46   : > { %p1725_p2 = pnand %p1723_p1, %p1897_p11  ;;  %p1732_p6 = por %p1731_p4, %p1730_p5 }
  0x48   : > { %p1726_p3 = pneg %p1725_p2 }
  0x4a   : > { %p1733_p7 = pnand %p1732_p6, %p1726_p3 }
  0x4c   : > { %1736 = shalt.err (!%p1733_p7)
}
  0x4d   : > { %s1785_s14 = smov [#allocation11]   ;;  %p1400_p8 = scmp.ge.s32.totalorder %s1775_s28, 2 }
  0x4e   : > { %1610 = dma.vmem_to_smem (!%p1883_p9), %s262_s30, 16, %s1785_s14, [#allocation10]  }
  0x4f   : > { %271 = sbr.rel (%p1400_p8) target bundleno = 100 (0x64), region = 40  ;;  %p3085_p10 = scmp.ne.s32.totalorder (!%p1400_p8), %s3080_s10, 0 }
  0x56   : > { %274 = sbr.rel (!%p3085_p10) target bundleno = 100 (0x64), region = 44  ;;  %s276_s25 = sand.u32 (%p3085_p10), 1, %s1771_s27  }
  0x57   : > { %s1570_s8 = sshll.u32 (%p3085_p10), %s1775_s28, 5  ;;  %s1401_s16 = sshll.u32 (%p3085_p10), %s276_s25, 6 }
  0x58   : > { %s3086_s0 = sld [smem:[#allocation15_spill]] (%p3085_p10)  ;;  %s278_s19 = scalar_lea.vmem (%p3085_p10), [#allocation3], %s1401_s16 }
  0x5e   : > { %s282_s20 = scalar_lea.vmem %s3086_s0, %s1570_s8 }
  0x5f   : > { %v295_v0 = vld [vmem:[%s282_s20] sm:$0xff]  ;;  %v297_v1 = vld [vmem:[%s282_s20 + $0x8] sm:$0xff]  ;;  %v299_v2 = vld [vmem:[%s282_s20 + $0x10] sm:$0xff] }
  0x60   : > { %296 = vst [vmem:[%s278_s19] sm:$0xff] %v295_v0  ;;  %298 = vst [vmem:[%s278_s19 + $0x8] sm:$0xff] %v297_v1  ;;  %v301_v3 = vld [vmem:[%s282_s20 + $0x18] sm:$0xff]  ;;  %v303_v4 = vld [vmem:[%s282_s20 + $0x40] sm:$0xff] }
  0x61   : > { %300 = vst [vmem:[%s278_s19 + $0x10] sm:$0xff] %v299_v2  ;;  %v305_v5 = vld [vmem:[%s282_s20 + $0x48] sm:$0xff]  ;;  %302 = vst [vmem:[%s278_s19 + $0x18] sm:$0xff] %v301_v3  ;;  %v307_v6 = vld [vmem:[%s282_s20 + $0x50] sm:$0xff] }
  0x62   : > { %304 = vst [vmem:[%s278_s19 + $0x20] sm:$0xff] %v303_v4  ;;  %306 = vst [vmem:[%s278_s19 + $0x28] sm:$0xff] %v305_v5  ;;  %v309_v7 = vld [vmem:[%s282_s20 + $0x58] sm:$0xff] }
  0x63   : > { %308 = vst [vmem:[%s278_s19 + $0x30] sm:$0xff] %v307_v6  ;;  %310 = vst [vmem:[%s278_s19 + $0x38] sm:$0xff] %v309_v7 }
  0x64 PF: > { %p3087_p9 = scmp.ne.s32.totalorder %s3082_s12, 0 }
  0x65   : > { %s322_s10 = sand.u32 (!%p3087_p9), 1, %s1767_s26   ;;  %p3088_p11 = scmp.ne.s32.totalorder (!%p3087_p9), %s3081_s11, 0 }
  0x66   : > { %319 = sbr.rel (%p3087_p9) target bundleno = 315 (0x13b), region = 67  ;;  %s1944_s21 = sshll.u32 (!%p3087_p9), %s322_s10, 6 }
  0x6d   : > { %1754 = dma.done.wait (%p3088_p11), [#allocation5], 16  }
  0x6e   : > { %1756 = vsyncadd (%p3088_p11), [#allocation5], 4294967280 }
  0x6f   : > { %1758 = dma.done.wait (%p3088_p11), [#allocation7], 32  }
  0x70   : > { %1760 = vsyncadd (%p3088_p11), [#allocation7], 4294967264 }
  0x71   : > { %1762 = dma.done.wait (%p3088_p11), [#allocation10], 32  }
  0x72   : > { %1764 = vsyncadd (%p3088_p11), [#allocation10], 4294967264 }
  0x73   : > { %348 = sfence }
  0x74   : > { %s1412_s26 = sshll.u32 %s1392_s6, 1  ;;  %s1966_s30 = smov 0  }
  0x75   : > { %p377_p12 = scmp.lt.s32.totalorder %s1412_s26, 3 }
  0x77   : > { %s3095_s26 = smov (!%p377_p12, %s1412_s26), 3 }
  0x78   : > { %s1571_s12 = sshll.u32 %s3095_s26, 4 }
  0x79   : > { %s1964_s24 = scalar_lea.vmem %s3074_s7, %s1571_s12 }
  0x7a LB: >> { %s399_s28 = sld [smem:[#allocation4]]  ;;  %s1421_s6 = sld [smem:[#allocation4 + $0x1]]  ;;  %s1779_s30 = sphi %s1966_s30, %s388_s30  }
  0x7b   : >> { %s3078_s11 = sshll.u32 %s1779_s30, 4  ;;  %s409_s13 = sld [smem:[#allocation6]] }
  0x7c   : >> { %s3089_s18 = scalar_lea.vmem [#allocation3], %s1944_s21  ;;  %s1984_s25 = sld [smem:[#allocation8]] }
  0x7d   : >> { %s1976_s14 = scalar_lea.vmem %s3089_s18, %s3078_s11 [#allocation3]  ;;  %s1986_s8 = sld [smem:[#allocation8 + $0xa]] }
  0x7e   : >> { %v1979_v8 = vld [vmem:[%s1976_s14] sm:$0xff]  ;;  %v1982_v9 = vld [vmem:[%s1976_s14 + $0x8] sm:$0xff]  ;;  %s1994_s16 = sld [smem:[#allocation8 + $0x14]]  ;;  %s1996_s17 = sld [smem:[#allocation8 + $0x1e]] }
  0x7f   : >> { %v1989_v10 = vld [vmem:[%s1976_s14 + $0x20] sm:$0xff]  ;;  %v1992_v11 = vld [vmem:[%s1976_s14 + $0x28] sm:$0xff]  ;;  %s1998_s15 = sld [smem:[#allocation8 + $0x28]]  ;;  %s2000_s20 = sld [smem:[#allocation8 + $0x32]] }
  0x80   : >> { %v400_v12 = vstv %s399_s28  ;;  %v404_v15 = vstv %s1421_s6  ;;  %s2004_s19 = sld [smem:[#allocation8 + $0x3c]]  ;;  %s2006_s10 = sld [smem:[#allocation8 + $0x46]] }
  0x81   : >> { %v401_v13 = vmul.f32 %v400_v12, %v1979_v8  ;;  %v402_v14 = vmul.f32 %v400_v12, %v1982_v9  ;;  %v405_v16 = vmul.f32 %v1989_v10, %v404_v15  ;;  %v406_v17 = vmul.f32 %v1992_v11, %v404_v15  ;;  %s2010_s26 = sld [smem:[#allocation8 + $0x50]]  ;;  %s2012_s12 = sld [smem:[#allocation8 + $0x5a]] }
  0x82   : >> { %v410_v18 = vstv %s409_s13  ;;  %s2014_s23 = sld [smem:[#allocation4 + $0x2]]  ;;  %s2016_s22 = sld [smem:[#allocation4 + $0x3]]  ;;  %v416_v23 = vstv %s1984_s25 }
  0x83   : >> { %v407_v19 = vadd.f32 %v405_v16, %v401_v13  ;;  %v408_v20 = vadd.f32 %v406_v17, %v402_v14  ;;  %v420_v24 = vstv %s1986_s8  ;;  %s2020_s28 = sld [smem:[#allocation6 + $0x1]]  ;;  %s2028_s13 = sld [smem:[#allocation8 + $0xb]] }
  0x84   : >> { %s2022_s6 = sld [smem:[#allocation8 + $0x1]]  ;;  %v424_v25 = vstv %s1994_s16  ;;  %v428_v26 = vstv %s1996_s17  ;;  %s2030_s18 = sld [smem:[#allocation8 + $0x15]] }
  0x85   : >> { %v411_v21 = vadd.f32 %v410_v18, %v407_v19  ;;  %v412_v22 = vadd.f32 %v410_v18, %v408_v20  ;;  %v432_v27 = vstv %s1998_s15  ;;  %v436_v28 = vstv %s2000_s20  ;;  %s2034_s25 = sld [smem:[#allocation8 + $0x1f]]  ;;  %s2036_s8 = sld [smem:[#allocation8 + $0x29]] }
  0x86   : >> { %v440_v31 = vstv %s2004_s19  ;;  %v444_v32 = vstv %s2006_s10  ;;  %s2042_s16 = sld [smem:[#allocation8 + $0x33]]  ;;  %s2044_s17 = sld [smem:[#allocation8 + $0x3d]] }
  0x87   : >> { %v413_v29 = vmax.f32 %v411_v21, 0.0  ;;  %v414_v30 = vmax.f32 %v412_v22, 0.0  ;;  %v448_v33 = vstv %s2010_s26  ;;  %v452_v34 = vstv %s2012_s12  ;;  %s2054_s15 = sld [smem:[#allocation8 + $0x47]]  ;;  %s2056_s20 = sld [smem:[#allocation8 + $0x51]] }
  0x88   : >> { %v456_v35 = vstv %s2014_s23  ;;  %v460_v36 = vstv %s2016_s22  ;;  %s2066_s19 = sld [smem:[#allocation8 + $0x5b]]  ;;  %s2068_s10 = sld [smem:[#allocation4 + $0x4]] }
  0x89   : >> { %v2046_v37 = vmul.f32 %v416_v23, %v413_v29  ;;  %v2048_v38 = vmul.f32 %v416_v23, %v414_v30  ;;  %v2050_v39 = vmul.f32 %v420_v24, %v413_v29  ;;  %v2052_v40 = vmul.f32 %v420_v24, %v414_v30  ;;  %s2078_s26 = sld [smem:[#allocation4 + $0x5]]  ;;  %s2080_s12 = sld [smem:[#allocation6 + $0x2]] }
  0x8a   : >> { %v2058_v41 = vmul.f32 %v424_v25, %v413_v29  ;;  %v2060_v42 = vmul.f32 %v424_v25, %v414_v30  ;;  %v2062_v43 = vmul.f32 %v428_v26, %v413_v29  ;;  %v2064_v44 = vmul.f32 %v428_v26, %v414_v30  ;;  %s2090_s23 = sld [smem:[#allocation8 + $0x2]]  ;;  %s2092_s22 = sld [smem:[#allocation8 + $0xc]] }
  0x8b   : >> { %v2070_v45 = vmul.f32 %v432_v27, %v413_v29  ;;  %v2072_v46 = vmul.f32 %v432_v27, %v414_v30  ;;  %v2074_v47 = vmul.f32 %v436_v28, %v413_v29  ;;  %v2076_v48 = vmul.f32 %v436_v28, %v414_v30  ;;  %s2102_s11 = sld [smem:[#allocation8 + $0x16]]  ;;  %s2104_s0 = sld [smem:[#allocation8 + $0x20]] }
  0x8c   : >> { %v2082_v49 = vmul.f32 %v440_v31, %v413_v29  ;;  %v2084_v50 = vmul.f32 %v440_v31, %v414_v30  ;;  %v2086_v51 = vmul.f32 %v444_v32, %v413_v29  ;;  %v2088_v52 = vmul.f32 %v444_v32, %v414_v30 }
  0x8d   : >> { %v2094_v53 = vmul.f32 %v448_v33, %v413_v29  ;;  %v2096_v54 = vmul.f32 %v448_v33, %v414_v30  ;;  %v2098_v55 = vmul.f32 %v452_v34, %v413_v29  ;;  %v2100_v56 = vmul.f32 %v452_v34, %v414_v30 }
  0x8e   : >> { %v457_v57 = vmul.f32 %v456_v35, %v1979_v8  ;;  %v458_v58 = vmul.f32 %v456_v35, %v1982_v9  ;;  %v461_v59 = vmul.f32 %v1989_v10, %v460_v36  ;;  %v462_v60 = vmul.f32 %v1992_v11, %v460_v36 }
  0x8f   : >> { %v466_v61 = vstv %s2020_s28  ;;  %v472_v62 = vstv %s2022_s6  ;;  %v478_v63 = vstv %s2028_s13  ;;  %v484_v0 = vstv %s2030_s18  ;;  %s2132_s18 = sld [smem:[#allocation8 + $0x2a]]  ;;  %s2134_s28 = sld [smem:[#allocation8 + $0x34]] }
  0x90   : >> { %v463_v1 = vadd.f32 %v461_v59, %v457_v57  ;;  %v464_v2 = vadd.f32 %v462_v60, %v458_v58  ;;  %v490_v3 = vstv %s2034_s25  ;;  %v496_v4 = vstv %s2036_s8  ;;  %s2148_s6 = sld [smem:[#allocation8 + $0x3e]]  ;;  %s2150_s13 = sld [smem:[#allocation8 + $0x48]] }
  0x91   : >> { %v502_v5 = vstv %s2042_s16  ;;  %v508_v6 = vstv %s2044_s17  ;;  %v514_v7 = vstv %s2054_s15  ;;  %v520_v12 = vstv %s2056_s20  ;;  %s2164_s25 = sld [smem:[#allocation8 + $0x52]]  ;;  %s2166_s8 = sld [smem:[#allocation8 + $0x5c]] }
  0x92   : >> { %v467_v13 = vadd.f32 %v466_v61, %v463_v1  ;;  %v468_v14 = vadd.f32 %v466_v61, %v464_v2  ;;  %v526_v15 = vstv %s2066_s19  ;;  %v532_v16 = vstv %s2068_s10  ;;  %s2168_s16 = sld [smem:[#allocation4 + $0x6]]  ;;  %s2170_s17 = sld [smem:[#allocation4 + $0x7]] }
  0x93   : >> { %v533_v17 = vmul.f32 %v532_v16, %v1979_v8  ;;  %v534_v18 = vmul.f32 %v532_v16, %v1982_v9  ;;  %v536_v19 = vstv %s2078_s26  ;;  %v542_v20 = vstv %s2080_s12  ;;  %s2184_s15 = sld [smem:[#allocation6 + $0x3]]  ;;  %s2246_s19 = sld [smem:[#allocation8 + $0xd]] }
  0x94   : >> { %v469_v21 = vmax.f32 %v467_v13, 0.0  ;;  %v470_v22 = vmax.f32 %v468_v14, 0.0  ;;  %v537_v23 = vmul.f32 %v1989_v10, %v536_v19  ;;  %v538_v24 = vmul.f32 %v1992_v11, %v536_v19  ;;  %s2186_s20 = sld [smem:[#allocation8 + $0x3]]  ;;  %s2248_s10 = sld [smem:[#allocation8 + $0x17]] }
  0x95   : >> { %v548_v25 = vstv %s2090_s23  ;;  %v554_v26 = vstv %s2092_s22  ;;  %v560_v27 = vstv %s2102_s11  ;;  %v566_v28 = vstv %s2104_s0  ;;  %s2262_s11 = sld [smem:[#allocation8 + $0x21]]  ;;  %s2264_s0 = sld [smem:[#allocation8 + $0x2b]] }
  0x96   : >> { %v473_v29 = vmul.f32 %v472_v62, %v469_v21  ;;  %v474_v30 = vmul.f32 %v472_v62, %v470_v22  ;;  %v479_v31 = vmul.f32 %v478_v63, %v469_v21  ;;  %v480_v32 = vmul.f32 %v478_v63, %v470_v22  ;;  %s2278_s26 = sld [smem:[#allocation8 + $0x35]]  ;;  %s2280_s12 = sld [smem:[#allocation8 + $0x3f]] }
  0x97   : >> { %v485_v33 = vmul.f32 %v484_v0, %v469_v21  ;;  %v486_v34 = vmul.f32 %v484_v0, %v470_v22  ;;  %v491_v35 = vmul.f32 %v490_v3, %v469_v21  ;;  %v492_v36 = vmul.f32 %v490_v3, %v470_v22  ;;  %s2282_s23 = sld [smem:[#allocation8 + $0x49]]  ;;  %s2284_s22 = sld [smem:[#allocation8 + $0x53]] }
  0x98   : >> { %v2137_v57 = vadd.f32 %v473_v29, %v2046_v37  ;;  %v2140_v58 = vadd.f32 %v474_v30, %v2048_v38  ;;  %v2143_v59 = vadd.f32 %v479_v31, %v2050_v39  ;;  %v2146_v60 = vadd.f32 %v480_v32, %v2052_v40 }
  0x99   : >> { %v2153_v61 = vadd.f32 %v485_v33, %v2058_v41  ;;  %v2156_v62 = vadd.f32 %v486_v34, %v2060_v42  ;;  %v2159_v37 = vadd.f32 %v491_v35, %v2062_v43  ;;  %v2162_v38 = vadd.f32 %v492_v36, %v2064_v44 }
  0x9a   : >> { %v497_v39 = vmul.f32 %v496_v4, %v469_v21  ;;  %v498_v40 = vmul.f32 %v496_v4, %v470_v22  ;;  %v503_v63 = vmul.f32 %v502_v5, %v469_v21  ;;  %v504_v0 = vmul.f32 %v502_v5, %v470_v22 }
  0x9b   : >> { %v509_v41 = vmul.f32 %v508_v6, %v469_v21  ;;  %v510_v42 = vmul.f32 %v508_v6, %v470_v22  ;;  %v515_v1 = vmul.f32 %v514_v7, %v469_v21  ;;  %v516_v43 = vmul.f32 %v514_v7, %v470_v22 }
  0x9c   : >> { %v2173_v2 = vadd.f32 %v497_v39, %v2070_v45  ;;  %v2176_v44 = vadd.f32 %v498_v40, %v2072_v46  ;;  %v2179_v3 = vadd.f32 %v503_v63, %v2074_v47  ;;  %v2182_v4 = vadd.f32 %v504_v0, %v2076_v48 }
  0x9d   : >> { %v2189_v5 = vadd.f32 %v509_v41, %v2082_v49  ;;  %v2192_v45 = vadd.f32 %v510_v42, %v2084_v50  ;;  %v2195_v46 = vadd.f32 %v515_v1, %v2086_v51  ;;  %v2198_v47 = vadd.f32 %v516_v43, %v2088_v52 }
  0x9e   : >> { %v521_v48 = vmul.f32 %v520_v12, %v469_v21  ;;  %v522_v6 = vmul.f32 %v520_v12, %v470_v22  ;;  %v527_v7 = vmul.f32 %v526_v15, %v469_v21  ;;  %v528_v49 = vmul.f32 %v526_v15, %v470_v22 }
  0x9f   : >> { %v539_v13 = vadd.f32 %v537_v23, %v533_v17  ;;  %v540_v50 = vadd.f32 %v538_v24, %v534_v18  ;;  %v572_v14 = vstv %s2132_s18  ;;  %v578_v16 = vstv %s2134_s28  ;;  %s2286_s18 = sld [smem:[#allocation8 + $0x5d]]  ;;  %s2288_s28 = sld [smem:[#allocation4 + $0x8]] }
  0xa0   : >> { %v2203_v51 = vadd.f32 %v521_v48, %v2094_v53  ;;  %v2206_v19 = vadd.f32 %v522_v6, %v2096_v54  ;;  %v2209_v52 = vadd.f32 %v527_v7, %v2098_v55  ;;  %v2212_v12 = vadd.f32 %v528_v49, %v2100_v56 }
  0xa1   : >> { %v543_v15 = vadd.f32 %v542_v20, %v539_v13  ;;  %v544_v17 = vadd.f32 %v542_v20, %v540_v50  ;;  %v584_v18 = vstv %s2148_s6  ;;  %v590_v53 = vstv %s2150_s13  ;;  %s2302_s6 = sld [smem:[#allocation4 + $0x9]]  ;;  %s2304_s13 = sld [smem:[#allocation6 + $0x4]] }
  0xa2   : >> { %v596_v54 = vstv %s2164_s25  ;;  %v602_v21 = vstv %s2166_s8  ;;  %v608_v55 = vstv %s2168_s16  ;;  %v612_v22 = vstv %s2170_s17  ;;  %s2352_s25 = sld [smem:[#allocation8 + $0x4]]  ;;  %s2354_s8 = sld [smem:[#allocation8 + $0xe]] }
  0xa3   : >> { %v545_v56 = vmax.f32 %v543_v15, 0.0  ;;  %v546_v23 = vmax.f32 %v544_v17, 0.0  ;;  %v609_v24 = vmul.f32 %v608_v55, %v1979_v8  ;;  %v610_v29 = vmul.f32 %v608_v55, %v1982_v9  ;;  %s2356_s16 = sld [smem:[#allocation8 + $0x18]]  ;;  %s2358_s17 = sld [smem:[#allocation8 + $0x22]] }
  0xa4   : >> { %v613_v20 = vmul.f32 %v1989_v10, %v612_v22  ;;  %v614_v30 = vmul.f32 %v1992_v11, %v612_v22  ;;  %v618_v31 = vstv %s2184_s15  ;;  %v624_v32 = vstv %s2186_s20  ;;  %s2372_s15 = sld [smem:[#allocation8 + $0x2c]]  ;;  %s2374_s20 = sld [smem:[#allocation8 + $0x36]] }
  0xa5   : >> { %v549_v33 = vmul.f32 %v548_v25, %v545_v56  ;;  %v550_v34 = vmul.f32 %v548_v25, %v546_v23  ;;  %v555_v35 = vmul.f32 %v554_v26, %v545_v56  ;;  %v556_v36 = vmul.f32 %v554_v26, %v546_v23 }
  0xa6   : >> { %v561_v39 = vmul.f32 %v560_v27, %v545_v56  ;;  %v562_v40 = vmul.f32 %v560_v27, %v546_v23  ;;  %v567_v63 = vmul.f32 %v566_v28, %v545_v56  ;;  %v568_v0 = vmul.f32 %v566_v28, %v546_v23 }
  0xa7   : >> { %v2251_v41 = vadd.f32 %v549_v33, %v2137_v57  ;;  %v2254_v25 = vadd.f32 %v550_v34, %v2140_v58  ;;  %v2257_v26 = vadd.f32 %v555_v35, %v2143_v59  ;;  %v2260_v42 = vadd.f32 %v556_v36, %v2146_v60 }
  0xa8   : >> { %v2267_v27 = vadd.f32 %v561_v39, %v2153_v61  ;;  %v2270_v28 = vadd.f32 %v562_v40, %v2156_v62  ;;  %v2273_v57 = vadd.f32 %v567_v63, %v2159_v37  ;;  %v2276_v58 = vadd.f32 %v568_v0, %v2162_v38 }
  0xa9   : >> { %v573_v59 = vmul.f32 %v572_v14, %v545_v56  ;;  %v574_v60 = vmul.f32 %v572_v14, %v546_v23  ;;  %v579_v1 = vmul.f32 %v578_v16, %v545_v56  ;;  %v580_v43 = vmul.f32 %v578_v16, %v546_v23 }
  0xaa   : >> { %v585_v61 = vmul.f32 %v584_v18, %v545_v56  ;;  %v586_v62 = vmul.f32 %v584_v18, %v546_v23  ;;  %v591_v48 = vmul.f32 %v590_v53, %v545_v56  ;;  %v592_v37 = vmul.f32 %v590_v53, %v546_v23 }
  0xab   : >> { %v2291_v38 = vadd.f32 %v573_v59, %v2173_v2  ;;  %v2294_v6 = vadd.f32 %v574_v60, %v2176_v44  ;;  %v2297_v7 = vadd.f32 %v579_v1, %v2179_v3  ;;  %v2300_v49 = vadd.f32 %v580_v43, %v2182_v4 }
  0xac   : >> { %v2307_v13 = vadd.f32 %v585_v61, %v2189_v5  ;;  %v2310_v2 = vadd.f32 %v586_v62, %v2192_v45  ;;  %v2313_v44 = vadd.f32 %v591_v48, %v2195_v46  ;;  %v2316_v3 = vadd.f32 %v592_v37, %v2198_v47 }
  0xad   : >> { %v597_v4 = vmul.f32 %v596_v54, %v545_v56  ;;  %v598_v50 = vmul.f32 %v596_v54, %v546_v23  ;;  %v603_v14 = vmul.f32 %v602_v21, %v545_v56  ;;  %v604_v16 = vmul.f32 %v602_v21, %v546_v23 }
  0xae   : >> { %v615_v5 = vadd.f32 %v613_v20, %v609_v24  ;;  %v616_v15 = vadd.f32 %v614_v30, %v610_v29  ;;  %v630_v45 = vstv %s2246_s19  ;;  %v636_v17 = vstv %s2248_s10  ;;  %s2388_s19 = sld [smem:[#allocation8 + $0x40]]  ;;  %s2390_s10 = sld [smem:[#allocation8 + $0x4a]] }
  0xaf   : >> { %v2321_v46 = vadd.f32 %v597_v4, %v2203_v51  ;;  %v2324_v47 = vadd.f32 %v598_v50, %v2206_v19  ;;  %v2327_v18 = vadd.f32 %v603_v14, %v2209_v52  ;;  %v2330_v53 = vadd.f32 %v604_v16, %v2212_v12 }
  0xb0   : >> { %v619_v54 = vadd.f32 %v618_v31, %v615_v5  ;;  %v620_v21 = vadd.f32 %v618_v31, %v616_v15  ;;  %v642_v55 = vstv %s2262_s11  ;;  %v648_v22 = vstv %s2264_s0  ;;  %s2392_s11 = sld [smem:[#allocation8 + $0x54]]  ;;  %s2394_s0 = sld [smem:[#allocation8 + $0x5e]] }
  0xb1   : >> { %v654_v56 = vstv %s2278_s26  ;;  %v660_v51 = vstv %s2280_s12  ;;  %v666_v23 = vstv %s2282_s23  ;;  %v672_v24 = vstv %s2284_s22  ;;  %s2396_s26 = sld [smem:[#allocation4 + $0xa]]  ;;  %s2398_s12 = sld [smem:[#allocation4 + $0xb]] }
  0xb2   : >> { %v621_v19 = vmax.f32 %v619_v54, 0.0  ;;  %v622_v29 = vmax.f32 %v620_v21, 0.0  ;;  %v678_v20 = vstv %s2286_s18  ;;  %v684_v52 = vstv %s2288_s28  ;;  %s2412_s23 = sld [smem:[#allocation6 + $0x5]]  ;;  %s2428_s18 = sld [smem:[#allocation8 + $0xf]] }
  0xb3   : >> { %v2341_v30 = vmul.f32 %v684_v52, %v1979_v8  ;;  %v2344_v12 = vmul.f32 %v684_v52, %v1982_v9  ;;  %v688_v33 = vstv %s2302_s6  ;;  %v694_v34 = vstv %s2304_s13  ;;  %s2414_s22 = sld [smem:[#allocation8 + $0x5]]  ;;  %s2430_s28 = sld [smem:[#allocation8 + $0x19]] }
  0xb4   : >> { %v625_v31 = vmul.f32 %v624_v32, %v621_v19  ;;  %v626_v35 = vmul.f32 %v624_v32, %v622_v29  ;;  %v631_v36 = vmul.f32 %v630_v45, %v621_v19  ;;  %v632_v39 = vmul.f32 %v630_v45, %v622_v29  ;;  %s2472_s6 = sld [smem:[#allocation8 + $0x23]]  ;;  %s2474_s13 = sld [smem:[#allocation8 + $0x2d]] }
  0xb5   : >> { %v637_v40 = vmul.f32 %v636_v17, %v621_v19  ;;  %v638_v63 = vmul.f32 %v636_v17, %v622_v29  ;;  %v643_v0 = vmul.f32 %v642_v55, %v621_v19  ;;  %v644_v59 = vmul.f32 %v642_v55, %v622_v29 }
  0xb6   : >> { %v2361_v60 = vadd.f32 %v625_v31, %v2251_v41  ;;  %v2364_v1 = vadd.f32 %v626_v35, %v2254_v25  ;;  %v2367_v32 = vadd.f32 %v631_v36, %v2257_v26  ;;  %v2370_v43 = vadd.f32 %v632_v39, %v2260_v42 }
  0xb7   : >> { %v2377_v61 = vadd.f32 %v637_v40, %v2267_v27  ;;  %v2380_v62 = vadd.f32 %v638_v63, %v2270_v28  ;;  %v2383_v41 = vadd.f32 %v643_v0, %v2273_v57  ;;  %v2386_v25 = vadd.f32 %v644_v59, %v2276_v58 }
  0xb8   : >> { %v649_v26 = vmul.f32 %v648_v22, %v621_v19  ;;  %v650_v42 = vmul.f32 %v648_v22, %v622_v29  ;;  %v655_v48 = vmul.f32 %v654_v56, %v621_v19  ;;  %v656_v37 = vmul.f32 %v654_v56, %v622_v29 }
  0xb9   : >> { %v661_v27 = vmul.f32 %v660_v51, %v621_v19  ;;  %v662_v28 = vmul.f32 %v660_v51, %v622_v29  ;;  %v667_v4 = vmul.f32 %v666_v23, %v621_v19  ;;  %v668_v57 = vmul.f32 %v666_v23, %v622_v29 }
  0xba   : >> { %v2401_v58 = vadd.f32 %v649_v26, %v2291_v38  ;;  %v2404_v50 = vadd.f32 %v650_v42, %v2294_v6  ;;  %v2407_v14 = vadd.f32 %v655_v48, %v2297_v7  ;;  %v2410_v16 = vadd.f32 %v656_v37, %v2300_v49 }
  0xbb   : >> { %v2417_v5 = vadd.f32 %v661_v27, %v2307_v13  ;;  %v2420_v38 = vadd.f32 %v662_v28, %v2310_v2  ;;  %v2423_v6 = vadd.f32 %v667_v4, %v2313_v44  ;;  %v2426_v7 = vadd.f32 %v668_v57, %v2316_v3 }
  0xbc   : >> { %v673_v15 = vmul.f32 %v672_v24, %v621_v19  ;;  %v674_v49 = vmul.f32 %v672_v24, %v622_v29  ;;  %v679_v45 = vmul.f32 %v678_v20, %v621_v19  ;;  %v680_v17 = vmul.f32 %v678_v20, %v622_v29 }
  0xbd   : >> { %v689_v13 = vmul.f32 %v1989_v10, %v688_v33  ;;  %v690_v2 = vmul.f32 %v1992_v11, %v688_v33  ;;  %v700_v44 = vstv %s2352_s25  ;;  %v706_v3 = vstv %s2354_s8  ;;  %s2488_s25 = sld [smem:[#allocation8 + $0x37]]  ;;  %s2490_s8 = sld [smem:[#allocation8 + $0x41]] }
  0xbe   : >> { %v2437_v54 = vadd.f32 %v673_v15, %v2321_v46  ;;  %v2440_v21 = vadd.f32 %v674_v49, %v2324_v47  ;;  %v2443_v55 = vadd.f32 %v679_v45, %v2327_v18  ;;  %v2446_v22 = vadd.f32 %v680_v17, %v2330_v53 }
  0xbf   : >> { %v691_v56 = vadd.f32 %v689_v13, %v2341_v30  ;;  %v692_v51 = vadd.f32 %v690_v2, %v2344_v12  ;;  %v712_v23 = vstv %s2356_s16  ;;  %v718_v46 = vstv %s2358_s17  ;;  %s2504_s16 = sld [smem:[#allocation8 + $0x4b]]  ;;  %s2506_s17 = sld [smem:[#allocation8 + $0x55]] }
  0xc0   : >> { %v724_v24 = vstv %s2372_s15  ;;  %v730_v19 = vstv %s2374_s20  ;;  %v736_v29 = vstv %s2388_s19  ;;  %v742_v47 = vstv %s2390_s10  ;;  %s2508_s15 = sld [smem:[#allocation8 + $0x5f]]  ;;  %s2510_s20 = sld [smem:[#allocation4 + $0xc]] }
  0xc1   : >> { %v695_v18 = vadd.f32 %v694_v34, %v691_v56  ;;  %v696_v20 = vadd.f32 %v694_v34, %v692_v51  ;;  %v748_v52 = vstv %s2392_s11  ;;  %v754_v53 = vstv %s2394_s0  ;;  %s2512_s19 = sld [smem:[#allocation4 + $0xd]]  ;;  %s2514_s10 = sld [smem:[#allocation6 + $0x6]] }
  0xc2   : >> { %v760_v33 = vstv %s2396_s26  ;;  %v764_v31 = vstv %s2398_s12  ;;  %v770_v35 = vstv %s2412_s23  ;;  %v776_v30 = vstv %s2414_s22  ;;  %s2528_s11 = sld [smem:[#allocation8 + $0x6]]  ;;  %s2530_s0 = sld [smem:[#allocation8 + $0x10]] }
  0xc3   : >> { %v697_v36 = vmax.f32 %v695_v18, 0.0  ;;  %v698_v12 = vmax.f32 %v696_v20, 0.0  ;;  %v761_v39 = vmul.f32 %v760_v33, %v1979_v8  ;;  %v762_v40 = vmul.f32 %v760_v33, %v1982_v9  ;;  %s2590_s26 = sld [smem:[#allocation8 + $0x1a]]  ;;  %s2592_s12 = sld [smem:[#allocation8 + $0x24]] }
  0xc4   : >> { %v765_v63 = vmul.f32 %v1989_v10, %v764_v31  ;;  %v766_v0 = vmul.f32 %v1992_v11, %v764_v31  ;;  %v782_v59 = vstv %s2428_s18  ;;  %v788_v26 = vstv %s2430_s28  ;;  %s2606_s23 = sld [smem:[#allocation8 + $0x2e]]  ;;  %s2608_s22 = sld [smem:[#allocation8 + $0x38]] }
  0xc5   : >> { %v701_v42 = vmul.f32 %v700_v44, %v697_v36  ;;  %v702_v34 = vmul.f32 %v700_v44, %v698_v12  ;;  %v707_v48 = vmul.f32 %v706_v3, %v697_v36  ;;  %v708_v37 = vmul.f32 %v706_v3, %v698_v12  ;;  %s2622_s18 = sld [smem:[#allocation8 + $0x42]]  ;;  %s2624_s28 = sld [smem:[#allocation8 + $0x4c]] }
  0xc6   : >> { %v713_v27 = vmul.f32 %v712_v23, %v697_v36  ;;  %v714_v28 = vmul.f32 %v712_v23, %v698_v12  ;;  %v719_v4 = vmul.f32 %v718_v46, %v697_v36  ;;  %v720_v57 = vmul.f32 %v718_v46, %v698_v12 }
  0xc7   : >> { %v2477_v15 = vadd.f32 %v701_v42, %v2361_v60  ;;  %v2480_v49 = vadd.f32 %v702_v34, %v2364_v1  ;;  %v2483_v45 = vadd.f32 %v707_v48, %v2367_v32  ;;  %v2486_v17 = vadd.f32 %v708_v37, %v2370_v43 }
  0xc8   : >> { %v2493_v13 = vadd.f32 %v713_v27, %v2377_v61  ;;  %v2496_v2 = vadd.f32 %v714_v28, %v2380_v62  ;;  %v2499_v60 = vadd.f32 %v719_v4, %v2383_v41  ;;  %v2502_v1 = vadd.f32 %v720_v57, %v2386_v25 }
  0xc9   : >> { %v725_v32 = vmul.f32 %v724_v24, %v697_v36  ;;  %v726_v43 = vmul.f32 %v724_v24, %v698_v12  ;;  %v731_v44 = vmul.f32 %v730_v19, %v697_v36  ;;  %v732_v3 = vmul.f32 %v730_v19, %v698_v12 }
  0xca   : >> { %v737_v61 = vmul.f32 %v736_v29, %v697_v36  ;;  %v738_v62 = vmul.f32 %v736_v29, %v698_v12  ;;  %v743_v56 = vmul.f32 %v742_v47, %v697_v36  ;;  %v744_v41 = vmul.f32 %v742_v47, %v698_v12 }
  0xcb   : >> { %v2517_v25 = vadd.f32 %v725_v32, %v2401_v58  ;;  %v2520_v51 = vadd.f32 %v726_v43, %v2404_v50  ;;  %v2523_v23 = vadd.f32 %v731_v44, %v2407_v14  ;;  %v2526_v46 = vadd.f32 %v732_v3, %v2410_v16 }
  0xcc   : >> { %v2533_v24 = vadd.f32 %v737_v61, %v2417_v5  ;;  %v2536_v58 = vadd.f32 %v738_v62, %v2420_v38  ;;  %v2539_v50 = vadd.f32 %v743_v56, %v2423_v6  ;;  %v2542_v14 = vadd.f32 %v744_v41, %v2426_v7 }
  0xcd   : >> { %v749_v16 = vmul.f32 %v748_v52, %v697_v36  ;;  %v750_v19 = vmul.f32 %v748_v52, %v698_v12  ;;  %v755_v29 = vmul.f32 %v754_v53, %v697_v36  ;;  %v756_v5 = vmul.f32 %v754_v53, %v698_v12 }
  0xce   : >> { %v767_v47 = vadd.f32 %v765_v63, %v761_v39  ;;  %v768_v38 = vadd.f32 %v766_v0, %v762_v40  ;;  %v794_v18 = vstv %s2472_s6  ;;  %v800_v20 = vstv %s2474_s13  ;;  %s2626_s6 = sld [smem:[#allocation8 + $0x56]]  ;;  %s2628_s13 = sld [smem:[#allocation8 + $0x60]] }
  0xcf   : >> { %v2547_v6 = vadd.f32 %v749_v16, %v2437_v54  ;;  %v2550_v7 = vadd.f32 %v750_v19, %v2440_v21  ;;  %v2553_v33 = vadd.f32 %v755_v29, %v2443_v55  ;;  %v2556_v52 = vadd.f32 %v756_v5, %v2446_v22 }
  0xd0   : >> { %v771_v53 = vadd.f32 %v770_v35, %v767_v47  ;;  %v772_v31 = vadd.f32 %v770_v35, %v768_v38  ;;  %v806_v54 = vstv %s2488_s25  ;;  %v812_v36 = vstv %s2490_s8  ;;  %s2630_s25 = sld [smem:[#allocation4 + $0xe]]  ;;  %s2632_s8 = sld [smem:[#allocation4 + $0xf]] }
  0xd1   : >> { %v818_v21 = vstv %s2504_s16  ;;  %v824_v12 = vstv %s2506_s17  ;;  %v830_v55 = vstv %s2508_s15  ;;  %v836_v39 = vstv %s2510_s20  ;;  %s2658_s16 = sld [smem:[#allocation6 + $0x7]]  ;;  %s2662_s15 = sld [smem:[#allocation8 + $0x11]] }
  0xd2   : >> { %v773_v40 = vmax.f32 %v771_v53, 0.0  ;;  %v774_v22 = vmax.f32 %v772_v31, 0.0  ;;  %v2569_v63 = vmul.f32 %v836_v39, %v1979_v8  ;;  %v2572_v0 = vmul.f32 %v836_v39, %v1982_v9  ;;  %s2660_s17 = sld [smem:[#allocation8 + $0x7]]  ;;  %s2664_s20 = sld [smem:[#allocation8 + $0x1b]] }
  0xd3   : >> { %v840_v35 = vstv %s2512_s19  ;;  %v846_v42 = vstv %s2514_s10  ;;  %v852_v34 = vstv %s2528_s11  ;;  %v858_v48 = vstv %s2530_s0  ;;  %s2712_s19 = sld [smem:[#allocation8 + $0x25]]  ;;  %s2714_s10 = sld [smem:[#allocation8 + $0x2f]] }
  0xd4   : >> { %v777_v37 = vmul.f32 %v776_v30, %v773_v40  ;;  %v778_v27 = vmul.f32 %v776_v30, %v774_v22  ;;  %v783_v28 = vmul.f32 %v782_v59, %v773_v40  ;;  %v784_v4 = vmul.f32 %v782_v59, %v774_v22  ;;  %s2720_s11 = sld [smem:[#allocation8 + $0x39]]  ;;  %s2722_s0 = sld [smem:[#allocation8 + $0x43]] }
  0xd5   : >> { %v789_v57 = vmul.f32 %v788_v26, %v773_v40  ;;  %v790_v32 = vmul.f32 %v788_v26, %v774_v22  ;;  %v795_v43 = vmul.f32 %v794_v18, %v773_v40  ;;  %v796_v44 = vmul.f32 %v794_v18, %v774_v22 }
  0xd6   : >> { %v2595_v3 = vadd.f32 %v777_v37, %v2477_v15  ;;  %v2598_v61 = vadd.f32 %v778_v27, %v2480_v49  ;;  %v2601_v30 = vadd.f32 %v783_v28, %v2483_v45  ;;  %v2604_v59 = vadd.f32 %v784_v4, %v2486_v17 }
  0xd7   : >> { %v2611_v26 = vadd.f32 %v789_v57, %v2493_v13  ;;  %v2614_v62 = vadd.f32 %v790_v32, %v2496_v2  ;;  %v2617_v15 = vadd.f32 %v795_v43, %v2499_v60  ;;  %v2620_v49 = vadd.f32 %v796_v44, %v2502_v1 }
  0xd8   : >> { %v801_v45 = vmul.f32 %v800_v20, %v773_v40  ;;  %v802_v17 = vmul.f32 %v800_v20, %v774_v22  ;;  %v807_v56 = vmul.f32 %v806_v54, %v773_v40  ;;  %v808_v41 = vmul.f32 %v806_v54, %v774_v22 }
  0xd9   : >> { %v813_v13 = vmul.f32 %v812_v36, %v773_v40  ;;  %v814_v2 = vmul.f32 %v812_v36, %v774_v22  ;;  %v819_v16 = vmul.f32 %v818_v21, %v773_v40  ;;  %v820_v60 = vmul.f32 %v818_v21, %v774_v22 }
  0xda   : >> { %v2635_v1 = vadd.f32 %v801_v45, %v2517_v25  ;;  %v2638_v19 = vadd.f32 %v802_v17, %v2520_v51  ;;  %v2641_v29 = vadd.f32 %v807_v56, %v2523_v23  ;;  %v2644_v5 = vadd.f32 %v808_v41, %v2526_v46 }
  0xdb   : >> { %v2647_v47 = vadd.f32 %v813_v13, %v2533_v24  ;;  %v2650_v38 = vadd.f32 %v814_v2, %v2536_v58  ;;  %v2653_v25 = vadd.f32 %v819_v16, %v2539_v50  ;;  %v2656_v51 = vadd.f32 %v820_v60, %v2542_v14 }
  0xdc   : >> { %v825_v23 = vmul.f32 %v824_v12, %v773_v40  ;;  %v826_v46 = vmul.f32 %v824_v12, %v774_v22  ;;  %v831_v18 = vmul.f32 %v830_v55, %v773_v40  ;;  %v832_v24 = vmul.f32 %v830_v55, %v774_v22 }
  0xdd   : >> { %v841_v58 = vmul.f32 %v1989_v10, %v840_v35  ;;  %v842_v50 = vmul.f32 %v1992_v11, %v840_v35  ;;  %v864_v14 = vstv %s2590_s26  ;;  %v870_v20 = vstv %s2592_s12  ;;  %s2728_s26 = sld [smem:[#allocation8 + $0x4d]]  ;;  %s2730_s12 = sld [smem:[#allocation8 + $0x57]] }
  0xde   : >> { %v2671_v53 = vadd.f32 %v825_v23, %v2547_v6  ;;  %v2674_v31 = vadd.f32 %v826_v46, %v2550_v7  ;;  %v2677_v54 = vadd.f32 %v831_v18, %v2553_v33  ;;  %v2680_v36 = vadd.f32 %v832_v24, %v2556_v52 }
  0xdf   : >> { %v843_v21 = vadd.f32 %v841_v58, %v2569_v63  ;;  %v844_v12 = vadd.f32 %v842_v50, %v2572_v0  ;;  %v876_v55 = vstv %s2606_s23  ;;  %v882_v39 = vstv %s2608_s22  ;;  %s2732_s23 = sld [smem:[#allocation8 + $0x61]]  ;;  %s2734_s22 = sld [smem:[#allocation4 + $0x10]] }
  0xe0   : >> { %v888_v40 = vstv %s2622_s18  ;;  %v894_v6 = vstv %s2624_s28  ;;  %v900_v22 = vstv %s2626_s6  ;;  %v906_v7 = vstv %s2628_s13  ;;  %s2788_s18 = sld [smem:[#allocation4 + $0x11]]  ;;  %s2790_s28 = sld [smem:[#allocation6 + $0x8]] }
  0xe1   : >> { %v847_v33 = vadd.f32 %v846_v42, %v843_v21  ;;  %v848_v52 = vadd.f32 %v846_v42, %v844_v12  ;;  %v912_v35 = vstv %s2630_s25  ;;  %v916_v63 = vstv %s2632_s8  ;;  %s2796_s6 = sld [smem:[#allocation8 + $0x8]]  ;;  %s2798_s13 = sld [smem:[#allocation8 + $0x12]] }
  0xe2   : >> { %v913_v0 = vmul.f32 %v912_v35, %v1979_v8  ;;  %v914_v37 = vmul.f32 %v912_v35, %v1982_v9  ;;  %v917_v27 = vmul.f32 %v1989_v10, %v916_v63  ;;  %v918_v28 = vmul.f32 %v1992_v11, %v916_v63  ;;  %s2808_s25 = sld [smem:[#allocation8 + $0x1c]]  ;;  %s2810_s8 = sld [smem:[#allocation8 + $0x26]] }
  0xe3   : >> { %v849_v4 = vmax.f32 %v847_v33, 0.0  ;;  %v850_v57 = vmax.f32 %v848_v52, 0.0  ;;  %v922_v32 = vstv %s2658_s16  ;;  %v928_v43 = vstv %s2660_s17  ;;  %s2820_s16 = sld [smem:[#allocation8 + $0x30]]  ;;  %s2822_s17 = sld [smem:[#allocation8 + $0x3a]] }
  0xe4   : >> { %v919_v44 = vadd.f32 %v917_v27, %v913_v0  ;;  %v920_v45 = vadd.f32 %v918_v28, %v914_v37  ;;  %v934_v42 = vstv %s2662_s15  ;;  %v940_v17 = vstv %s2664_s20  ;;  %s2824_s15 = sld [smem:[#allocation8 + $0x44]]  ;;  %s2826_s20 = sld [smem:[#allocation8 + $0x4e]] }
  0xe5   : >> { %v853_v56 = vmul.f32 %v852_v34, %v849_v4  ;;  %v854_v41 = vmul.f32 %v852_v34, %v850_v57  ;;  %v859_v8 = vmul.f32 %v858_v48, %v849_v4  ;;  %v860_v9 = vmul.f32 %v858_v48, %v850_v57 }
  0xe6   : >> { %v865_v13 = vmul.f32 %v864_v14, %v849_v4  ;;  %v866_v10 = vmul.f32 %v864_v14, %v850_v57  ;;  %v871_v2 = vmul.f32 %v870_v20, %v849_v4  ;;  %v872_v11 = vmul.f32 %v870_v20, %v850_v57 }
  0xe7   : >> { %v855_v16 = vadd.f32 %v853_v56, %v2595_v3  ;;  %v856_v60 = vadd.f32 %v854_v41, %v2598_v61  ;;  %v861_v23 = vadd.f32 %v859_v8, %v2601_v30  ;;  %v862_v34 = vadd.f32 %v860_v9, %v2604_v59 }
  0xe8   : >> { %v867_v48 = vadd.f32 %v865_v13, %v2611_v26  ;;  %v868_v46 = vadd.f32 %v866_v10, %v2614_v62  ;;  %v873_v18 = vadd.f32 %v871_v2, %v2617_v15  ;;  %v874_v24 = vadd.f32 %v872_v11, %v2620_v49 }
  0xe9   : >> { %v877_v3 = vmul.f32 %v876_v55, %v849_v4  ;;  %v878_v61 = vmul.f32 %v876_v55, %v850_v57  ;;  %v883_v30 = vmul.f32 %v882_v39, %v849_v4  ;;  %v884_v59 = vmul.f32 %v882_v39, %v850_v57 }
  0xea   : >> { %v889_v58 = vmul.f32 %v888_v40, %v849_v4  ;;  %v890_v26 = vmul.f32 %v888_v40, %v850_v57  ;;  %v895_v50 = vmul.f32 %v894_v6, %v849_v4  ;;  %v896_v62 = vmul.f32 %v894_v6, %v850_v57 }
  0xeb   : >> { %v2737_v15 = vadd.f32 %v877_v3, %v2635_v1  ;;  %v2740_v49 = vadd.f32 %v878_v61, %v2638_v19  ;;  %v2743_v14 = vadd.f32 %v883_v30, %v2641_v29  ;;  %v2746_v20 = vadd.f32 %v884_v59, %v2644_v5 }
  0xec   : >> { %v2749_v21 = vadd.f32 %v889_v58, %v2647_v47  ;;  %v2752_v12 = vadd.f32 %v890_v26, %v2650_v38  ;;  %v2755_v55 = vadd.f32 %v895_v50, %v2653_v25  ;;  %v2758_v1 = vadd.f32 %v896_v62, %v2656_v51 }
  0xed   : >> { %v901_v19 = vmul.f32 %v900_v22, %v849_v4  ;;  %v902_v29 = vmul.f32 %v900_v22, %v850_v57  ;;  %v907_v5 = vmul.f32 %v906_v7, %v849_v4  ;;  %v908_v39 = vmul.f32 %v906_v7, %v850_v57 }
  0xee   : >> { %v923_v47 = vadd.f32 %v922_v32, %v919_v44  ;;  %v924_v38 = vadd.f32 %v922_v32, %v920_v45  ;;  %v946_v40 = vstv %s2712_s19  ;;  %v952_v25 = vstv %s2714_s10  ;;  %s2828_s19 = sld [smem:[#allocation8 + $0x58]]  ;;  %s2830_s10 = sld [smem:[#allocation8 + $0x62]] }
  0xef   : >> { %v2763_v51 = vadd.f32 %v901_v19, %v2671_v53  ;;  %v2766_v6 = vadd.f32 %v902_v29, %v2674_v31  ;;  %v2769_v22 = vadd.f32 %v907_v5, %v2677_v54  ;;  %v2772_v7 = vadd.f32 %v908_v39, %v2680_v36  ;;  %v1660_v5 = vld [vmem:[%s1976_s14 + $0x20] sm:$0xff] }
  0xf0   : >> { %v925_v33 = vmax.f32 %v923_v47, 0.0  ;;  %v926_v52 = vmax.f32 %v924_v38, 0.0  ;;  %v958_v35 = vstv %s2720_s11  ;;  %v964_v63 = vstv %s2722_s0  ;;  %s2844_s11 = sld [smem:[#allocation4 + $0x12]]  ;;  %s2846_s0 = sld [smem:[#allocation4 + $0x13]]  ;;  %v1661_v47 = vld [vmem:[%s1976_s14 + $0x28] sm:$0xff] }
  0xf1   : >> { %v970_v0 = vstv %s2728_s26  ;;  %v976_v37 = vstv %s2730_s12  ;;  %v982_v27 = vstv %s2732_s23  ;;  %v988_v53 = vstv %s2734_s22  ;;  %s2860_s26 = sld [smem:[#allocation6 + $0x9]]  ;;  %s2868_s23 = sld [smem:[#allocation8 + $0x13]] }
  0xf2   : >> { %v929_v28 = vmul.f32 %v928_v43, %v925_v33  ;;  %v930_v31 = vmul.f32 %v928_v43, %v926_v52  ;;  %v935_v54 = vmul.f32 %v934_v42, %v925_v33  ;;  %v936_v4 = vmul.f32 %v934_v42, %v926_v52  ;;  %s2862_s12 = sld [smem:[#allocation8 + $0x9]]  ;;  %s2870_s22 = sld [smem:[#allocation8 + $0x1d]] }
  0xf3   : >> { %v941_v36 = vmul.f32 %v940_v17, %v925_v33  ;;  %v942_v57 = vmul.f32 %v940_v17, %v926_v52  ;;  %v947_v32 = vmul.f32 %v946_v40, %v925_v33  ;;  %v948_v44 = vmul.f32 %v946_v40, %v926_v52 }
  0xf4   : >> { %v2800_v45 = vadd.f32 %v929_v28, %v855_v16  ;;  %v2802_v43 = vadd.f32 %v930_v31, %v856_v60  ;;  %v2804_v56 = vadd.f32 %v935_v54, %v861_v23  ;;  %v2806_v42 = vadd.f32 %v936_v4, %v862_v34 }
  0xf5   : >> { %v2812_v41 = vadd.f32 %v941_v36, %v867_v48  ;;  %v2814_v17 = vadd.f32 %v942_v57, %v868_v46  ;;  %v2816_v8 = vadd.f32 %v947_v32, %v873_v18  ;;  %v2818_v9 = vadd.f32 %v948_v44, %v874_v24 }
  0xf6   : >> { %v953_v13 = vmul.f32 %v952_v25, %v925_v33  ;;  %v954_v10 = vmul.f32 %v952_v25, %v926_v52  ;;  %v959_v2 = vmul.f32 %v958_v35, %v925_v33  ;;  %v960_v11 = vmul.f32 %v958_v35, %v926_v52 }
  0xf7   : >> { %v965_v16 = vmul.f32 %v964_v63, %v925_v33  ;;  %v966_v60 = vmul.f32 %v964_v63, %v926_v52  ;;  %v971_v23 = vmul.f32 %v970_v0, %v925_v33  ;;  %v972_v34 = vmul.f32 %v970_v0, %v926_v52 }
  0xf8   : >> { %v2833_v48 = vadd.f32 %v953_v13, %v2737_v15  ;;  %v2836_v46 = vadd.f32 %v954_v10, %v2740_v49  ;;  %v2839_v18 = vadd.f32 %v959_v2, %v2743_v14  ;;  %v2842_v24 = vadd.f32 %v960_v11, %v2746_v20  ;;  %v1658_v15 = vld [vmem:[%s1976_s14] sm:$0xff]  ;;  %v1659_v14 = vld [vmem:[%s1976_s14 + $0x8] sm:$0xff]  ;;  %s2908_s14 = sld [smem:[#allocation8 + $0x3b]] }
  0xf9   : >> { %v2849_v3 = vadd.f32 %v965_v16, %v2749_v21  ;;  %v2852_v61 = vadd.f32 %v966_v60, %v2752_v12  ;;  %v2855_v30 = vadd.f32 %v971_v23, %v2755_v55  ;;  %v2858_v59 = vadd.f32 %v972_v34, %v2758_v1 }
  0xfa   : >> { %v977_v58 = vmul.f32 %v976_v37, %v925_v33  ;;  %v978_v26 = vmul.f32 %v976_v37, %v926_v52  ;;  %v983_v50 = vmul.f32 %v982_v27, %v925_v33  ;;  %v984_v62 = vmul.f32 %v982_v27, %v926_v52 }
  0xfb   : >> { %v989_v49 = vmul.f32 %v1658_v15, %v988_v53  ;;  %v990_v20 = vmul.f32 %v1659_v14, %v988_v53  ;;  %v992_v21 = vstv %s2788_s18  ;;  %v998_v12 = vstv %s2790_s28  ;;  %s2884_s18 = sld [smem:[#allocation8 + $0x27]]  ;;  %s2886_s28 = sld [smem:[#allocation8 + $0x31]] }
  0xfc   : >> { %v2873_v55 = vadd.f32 %v977_v58, %v2763_v51  ;;  %v2876_v1 = vadd.f32 %v978_v26, %v2766_v6  ;;  %v2879_v19 = vadd.f32 %v983_v50, %v2769_v22  ;;  %v2882_v29 = vadd.f32 %v984_v62, %v2772_v7 }
  0xfd   : >> { %v993_v39 = vmul.f32 %v1660_v5, %v992_v21  ;;  %v994_v38 = vmul.f32 %v1661_v47, %v992_v21  ;;  %v1004_v40 = vstv %s2796_s6  ;;  %v1010_v25 = vstv %s2798_s13  ;;  %s2910_s6 = sld [smem:[#allocation8 + $0x45]]  ;;  %s2916_s13 = sld [smem:[#allocation8 + $0x4f]] }
  0xfe   : >> { %v1016_v51 = vstv %s2808_s25  ;;  %v1022_v6 = vstv %s2810_s8  ;;  %v1028_v22 = vstv %s2820_s16  ;;  %v1034_v7 = vstv %s2822_s17  ;;  %s2918_s25 = sld [smem:[#allocation8 + $0x59]]  ;;  %s2924_s8 = sld [smem:[#allocation8 + $0x63]] }
  0xff   : >> { %v995_v33 = vadd.f32 %v993_v39, %v989_v49  ;;  %v996_v52 = vadd.f32 %v994_v38, %v990_v20  ;;  %v1040_v35 = vstv %s2824_s15  ;;  %v1046_v63 = vstv %s2826_s20  ;;  %s2926_s16 = sld [smem:[#allocation9]]  ;;  %s2930_s15 = sld [smem:[#allocation9 + $0x1]] }
 0x100   : >> { %v1052_v0 = vstv %s2828_s19  ;;  %v1058_v37 = vstv %s2830_s10  ;;  %v1064_v27 = vstv %s2844_s11  ;;  %v1068_v53 = vstv %s2846_s0  ;;  %s2928_s17 = sld [smem:[#allocation11]]  ;;  %s2968_s20 = sld [smem:[#allocation11 + $0x1]] }
 0x101   : >> { %v999_v28 = vadd.f32 %v998_v12, %v995_v33  ;;  %v1000_v31 = vadd.f32 %v998_v12, %v996_v52  ;;  %v1065_v54 = vmul.f32 %v1658_v15, %v1064_v27  ;;  %v1066_v4 = vmul.f32 %v1659_v14, %v1064_v27  ;;  %s2970_s19 = sld [smem:[#allocation9 + $0x2]]  ;;  %s2978_s11 = sld [smem:[#allocation9 + $0x3]] }
 0x102   : >> { %v1069_v36 = vmul.f32 %v1660_v5, %v1068_v53  ;;  %v1070_v57 = vmul.f32 %v1661_v47, %v1068_v53  ;;  %v1074_v32 = vstv %s2860_s26  ;;  %v1080_v44 = vstv %s2862_s12  ;;  %s2976_s10 = sld [smem:[#allocation11 + $0x2]]  ;;  %s2988_s0 = sld [smem:[#allocation11 + $0x3]] }
 0x103   : >> { %v1001_v13 = vmax.f32 %v999_v28, 0.0  ;;  %v1002_v10 = vmax.f32 %v1000_v31, 0.0  ;;  %v1086_v2 = vstv %s2868_s23  ;;  %v1092_v11 = vstv %s2870_s22  ;;  %s2990_s26 = sld [smem:[#allocation9 + $0x4]]  ;;  %s2994_s23 = sld [smem:[#allocation9 + $0x5]] }
 0x104   : >> { %v1071_v16 = vadd.f32 %v1069_v36, %v1065_v54  ;;  %v1072_v60 = vadd.f32 %v1070_v57, %v1066_v4  ;;  %v1098_v23 = vstv %s2884_s18  ;;  %v1104_v34 = vstv %s2886_s28  ;;  %s2992_s12 = sld [smem:[#allocation11 + $0x4]]  ;;  %s3008_s22 = sld [smem:[#allocation11 + $0x5]] }
 0x105   : >> { %v1005_v58 = vmul.f32 %v1004_v40, %v1001_v13  ;;  %v1006_v26 = vmul.f32 %v1004_v40, %v1002_v10  ;;  %v1011_v50 = vmul.f32 %v1010_v25, %v1001_v13  ;;  %v1012_v62 = vmul.f32 %v1010_v25, %v1002_v10  ;;  %s3010_s18 = sld [smem:[#allocation9 + $0x6]] }
 0x106   : >> { %v1017_v49 = vmul.f32 %v1016_v51, %v1001_v13  ;;  %v1018_v20 = vmul.f32 %v1016_v51, %v1002_v10  ;;  %v1023_v15 = vmul.f32 %v1022_v6, %v1001_v13  ;;  %v1024_v14 = vmul.f32 %v1022_v6, %v1002_v10  ;;  %s3018_s28 = sld [smem:[#allocation11 + $0x6]] }
 0x107   : >> { %v1007_v21 = vadd.f32 %v1005_v58, %v2800_v45  ;;  %v1008_v12 = vadd.f32 %v1006_v26, %v2802_v43  ;;  %v1013_v5 = vadd.f32 %v1011_v50, %v2804_v56  ;;  %v1014_v39 = vadd.f32 %v1012_v62, %v2806_v42 }
 0x108   : >> { %v1019_v47 = vadd.f32 %v1017_v49, %v2812_v41  ;;  %v1020_v38 = vadd.f32 %v1018_v20, %v2814_v17  ;;  %v1025_v40 = vadd.f32 %v1023_v15, %v2816_v8  ;;  %v1026_v25 = vadd.f32 %v1024_v14, %v2818_v9 }
 0x109   : >> { %v1029_v45 = vmul.f32 %v1028_v22, %v1001_v13  ;;  %v1030_v43 = vmul.f32 %v1028_v22, %v1002_v10  ;;  %v1035_v56 = vmul.f32 %v1034_v7, %v1001_v13  ;;  %v1036_v42 = vmul.f32 %v1034_v7, %v1002_v10 }
 0x10a   : >> { %v1041_v51 = vmul.f32 %v1040_v35, %v1001_v13  ;;  %v1042_v41 = vmul.f32 %v1040_v35, %v1002_v10  ;;  %v1047_v6 = vmul.f32 %v1046_v63, %v1001_v13  ;;  %v1048_v17 = vmul.f32 %v1046_v63, %v1002_v10 }
 0x10b   : >> { %v1031_v8 = vadd.f32 %v1029_v45, %v2833_v48  ;;  %v1032_v9 = vadd.f32 %v1030_v43, %v2836_v46  ;;  %v1037_v33 = vadd.f32 %v1035_v56, %v2839_v18  ;;  %v1038_v22 = vadd.f32 %v1036_v42, %v2842_v24 }
 0x10c   : >> { %v1043_v7 = vadd.f32 %v1041_v51, %v2849_v3  ;;  %v1044_v52 = vadd.f32 %v1042_v41, %v2852_v61  ;;  %v1049_v27 = vadd.f32 %v1047_v6, %v2855_v30  ;;  %v1050_v35 = vadd.f32 %v1048_v17, %v2858_v59 }
 0x10d   : >> { %v1053_v63 = vmul.f32 %v1052_v0, %v1001_v13  ;;  %v1054_v53 = vmul.f32 %v1052_v0, %v1002_v10  ;;  %v1059_v48 = vmul.f32 %v1058_v37, %v1001_v13  ;;  %v1060_v46 = vmul.f32 %v1058_v37, %v1002_v10 }
 0x10e   : >> { %v1075_v18 = vadd.f32 %v1074_v32, %v1071_v16  ;;  %v1076_v24 = vadd.f32 %v1074_v32, %v1072_v60  ;;  %v1110_v3 = vstv %s2908_s14  ;;  %v1116_v61 = vstv %s2910_s6  ;;  %s3020_s14 = sld [smem:[#allocation9 + $0x7]] }
 0x10f   : >> { %v1055_v30 = vadd.f32 %v1053_v63, %v2873_v55  ;;  %v1056_v59 = vadd.f32 %v1054_v53, %v2876_v1  ;;  %v1061_v0 = vadd.f32 %v1059_v48, %v2879_v19  ;;  %v1062_v37 = vadd.f32 %v1060_v46, %v2882_v29  ;;  %s3024_s6 = sld [smem:[#allocation11 + $0x7]] }
 0x110   : >> { %v1077_v28 = vmax.f32 %v1075_v18, 0.0  ;;  %v1078_v31 = vmax.f32 %v1076_v24, 0.0  ;;  %v1122_v54 = vstv %s2916_s13  ;;  %v1128_v4 = vstv %s2918_s25  ;;  %s3026_s13 = sld [smem:[#allocation9 + $0x8]] }
 0x111   : >> { %v1134_v36 = vstv %s2924_s8  ;;  %v1140_v57 = vstv %s2926_s16  ;;  %v1146_v32 = vstv %s2928_s17  ;;  %v1150_v13 = vstv %s2930_s15  ;;  %s3030_s25 = sld [smem:[#allocation11 + $0x8]]  ;;  %s3032_s8 = sld [smem:[#allocation9 + $0x9]] }
 0x112   : >> { %v1081_v55 = vmul.f32 %v1080_v44, %v1077_v28  ;;  %v1082_v10 = vmul.f32 %v1080_v44, %v1078_v31  ;;  %v1087_v1 = vmul.f32 %v1086_v2, %v1077_v28  ;;  %v1088_v19 = vmul.f32 %v1086_v2, %v1078_v31  ;;  %s3036_s16 = sld [smem:[#allocation11 + $0x9]]  ;;  %s1257_s17 = sld [smem:[#allocation2]] }
 0x113   : >> { %v1093_v29 = vmul.f32 %v1092_v11, %v1077_v28  ;;  %v1094_v16 = vmul.f32 %v1092_v11, %v1078_v31  ;;  %v1099_v60 = vmul.f32 %v1098_v23, %v1077_v28  ;;  %v1100_v58 = vmul.f32 %v1098_v23, %v1078_v31  ;;  %s3090_s15 = sshll.u32 %s1779_s30, 4  ;;  %s388_s30 = sadd.s32 1, %s1779_s30  }
 0x114   : >> { %v1083_v26 = vadd.f32 %v1081_v55, %v1007_v21  ;;  %v1084_v50 = vadd.f32 %v1082_v10, %v1008_v12  ;;  %v1089_v62 = vadd.f32 %v1087_v1, %v1013_v5  ;;  %v1090_v49 = vadd.f32 %v1088_v19, %v1014_v39  ;;  %p385_p13 = scmp.ge.s32.totalorder %s388_s30, 2  }
 0x115   : >> { %v1095_v20 = vadd.f32 %v1093_v29, %v1019_v47  ;;  %v1096_v44 = vadd.f32 %v1094_v16, %v1020_v38  ;;  %v1101_v15 = vadd.f32 %v1099_v60, %v1025_v40  ;;  %v1102_v14 = vadd.f32 %v1100_v58, %v1026_v25 }
 0x116   : >> { %v1105_v2 = vmul.f32 %v1104_v34, %v1077_v28  ;;  %v1106_v11 = vmul.f32 %v1104_v34, %v1078_v31  ;;  %v1111_v45 = vmul.f32 %v1110_v3, %v1077_v28  ;;  %v1112_v43 = vmul.f32 %v1110_v3, %v1078_v31 }
 0x117   : >> { %v1117_v23 = vmul.f32 %v1116_v61, %v1077_v28  ;;  %v1118_v21 = vmul.f32 %v1116_v61, %v1078_v31  ;;  %v1123_v12 = vmul.f32 %v1122_v54, %v1077_v28  ;;  %v1124_v5 = vmul.f32 %v1122_v54, %v1078_v31 }
 0x118   : >> { %v1107_v39 = vadd.f32 %v1105_v2, %v1031_v8  ;;  %v1108_v47 = vadd.f32 %v1106_v11, %v1032_v9  ;;  %v1113_v38 = vadd.f32 %v1111_v45, %v1037_v33  ;;  %v1114_v40 = vadd.f32 %v1112_v43, %v1038_v22 }
 0x119   : >> { %v2980_v25 = vadd.f32 %v1117_v23, %v1043_v7  ;;  %v2982_v56 = vadd.f32 %v1118_v21, %v1044_v52  ;;  %v2984_v42 = vadd.f32 %v1123_v12, %v1049_v27  ;;  %v2986_v34 = vadd.f32 %v1124_v5, %v1050_v35 }
 0x11a   : >> { %v1129_v51 = vmul.f32 %v1128_v4, %v1077_v28  ;;  %v1130_v41 = vmul.f32 %v1128_v4, %v1078_v31  ;;  %v1135_v6 = vmul.f32 %v1134_v36, %v1077_v28  ;;  %v1136_v17 = vmul.f32 %v1134_v36, %v1078_v31 }
 0x11b   : >> { %v1141_v8 = vadd.f32 %v1140_v57, %v1083_v26  ;;  %v1142_v9 = vadd.f32 %v1140_v57, %v1084_v50  ;;  %v1151_v33 = vadd.f32 %v1150_v13, %v1089_v62  ;;  %v1152_v22 = vadd.f32 %v1150_v13, %v1090_v49 }
 0x11c   : >> { %v2996_v7 = vadd.f32 %v1129_v51, %v1055_v30  ;;  %v2998_v52 = vadd.f32 %v1130_v41, %v1056_v59  ;;  %v3000_v27 = vadd.f32 %v1135_v6, %v1061_v0  ;;  %v3002_v35 = vadd.f32 %v1136_v17, %v1062_v37 }
 0x11d   : >> { %v1143_v63 = vmax.f32 %v1141_v8, 0.0  ;;  %v1144_v53 = vmax.f32 %v1142_v9, 0.0  ;;  %v1153_v48 = vmax.f32 %v1151_v33, 0.0  ;;  %v1154_v46 = vmax.f32 %v1152_v22, 0.0 }
 0x11e   : >> { %v1156_v18 = vstv %s2968_s20  ;;  %v1162_v24 = vstv %s2970_s19  ;;  %v1168_v3 = vstv %s2976_s10  ;;  %v1174_v61 = vstv %s2978_s11  ;;  %s1262_s20 = scalar_lea.vmem %s1964_s24, %s3090_s15 }
 0x11f   : >> { %v1147_v30 = vmul.f32 %v1146_v32, %v1143_v63  ;;  %v1148_v59 = vmul.f32 %v1146_v32, %v1144_v53  ;;  %v1157_v0 = vmul.f32 %v1156_v18, %v1153_v48  ;;  %v1158_v37 = vmul.f32 %v1156_v18, %v1154_v46 }
 0x120   : >> { %v1163_v28 = vadd.f32 %v1162_v24, %v1095_v20  ;;  %v1164_v31 = vadd.f32 %v1162_v24, %v1096_v44  ;;  %v1175_v54 = vadd.f32 %v1174_v61, %v1101_v15  ;;  %v1176_v4 = vadd.f32 %v1174_v61, %v1102_v14 }
 0x121   : >> { %v1159_v36 = vadd.f32 %v1157_v0, %v1147_v30  ;;  %v1160_v57 = vadd.f32 %v1158_v37, %v1148_v59  ;;  %v1180_v13 = vstv %s2988_s0  ;;  %v1186_v55 = vstv %s2990_s26 }
 0x122   : >> { %v1165_v10 = vmax.f32 %v1163_v28, 0.0  ;;  %v1166_v1 = vmax.f32 %v1164_v31, 0.0  ;;  %v1177_v19 = vmax.f32 %v1175_v54, 0.0  ;;  %v1178_v32 = vmax.f32 %v1176_v4, 0.0 }
 0x123   : >> { %v1187_v29 = vadd.f32 %v1186_v55, %v1107_v39  ;;  %v1188_v16 = vadd.f32 %v1186_v55, %v1108_v47  ;;  %v1192_v60 = vstv %s2992_s12  ;;  %v1198_v58 = vstv %s2994_s23 }
 0x124   : >> { %v1169_v26 = vmul.f32 %v1168_v3, %v1165_v10  ;;  %v1170_v50 = vmul.f32 %v1168_v3, %v1166_v1  ;;  %v1181_v62 = vmul.f32 %v1180_v13, %v1177_v19  ;;  %v1182_v49 = vmul.f32 %v1180_v13, %v1178_v32 }
 0x125   : >> { %v1189_v20 = vmax.f32 %v1187_v29, 0.0  ;;  %v1190_v44 = vmax.f32 %v1188_v16, 0.0  ;;  %v1199_v15 = vadd.f32 %v1198_v58, %v1113_v38  ;;  %v1200_v14 = vadd.f32 %v1198_v58, %v1114_v40 }
 0x126   : >> { %v1171_v2 = vadd.f32 %v1169_v26, %v1159_v36  ;;  %v1172_v11 = vadd.f32 %v1170_v50, %v1160_v57  ;;  %v1204_v45 = vstv %s3008_s22  ;;  %v1210_v43 = vstv %s3010_s18 }
 0x127   : >> { %v1193_v23 = vmul.f32 %v1192_v60, %v1189_v20  ;;  %v1194_v21 = vmul.f32 %v1192_v60, %v1190_v44  ;;  %v1201_v12 = vmax.f32 %v1199_v15, 0.0  ;;  %v1202_v5 = vmax.f32 %v1200_v14, 0.0 }
 0x128   : >> { %v1183_v39 = vadd.f32 %v1181_v62, %v1171_v2  ;;  %v1184_v47 = vadd.f32 %v1182_v49, %v1172_v11  ;;  %v1211_v38 = vadd.f32 %v1210_v43, %v2980_v25  ;;  %v1212_v40 = vadd.f32 %v1210_v43, %v2982_v56 }
 0x129   : >> { %v1205_v51 = vmul.f32 %v1204_v45, %v1201_v12  ;;  %v1206_v41 = vmul.f32 %v1204_v45, %v1202_v5  ;;  %v1216_v6 = vstv %s3018_s28  ;;  %v1222_v17 = vstv %s3020_s14 }
 0x12a   : >> { %v1195_v8 = vadd.f32 %v1193_v23, %v1183_v39  ;;  %v1196_v9 = vadd.f32 %v1194_v21, %v1184_v47  ;;  %v1213_v33 = vmax.f32 %v1211_v38, 0.0  ;;  %v1214_v22 = vmax.f32 %v1212_v40, 0.0 }
 0x12b   : >> { %v1223_v63 = vadd.f32 %v1222_v17, %v2984_v42  ;;  %v1224_v53 = vadd.f32 %v1222_v17, %v2986_v34  ;;  %v1228_v48 = vstv %s3024_s6  ;;  %v1234_v25 = vstv %s3026_s13 }
 0x12c   : >> { %v1207_v46 = vadd.f32 %v1205_v51, %v1195_v8  ;;  %v1208_v56 = vadd.f32 %v1206_v41, %v1196_v9  ;;  %v1217_v18 = vmul.f32 %v1216_v6, %v1213_v33  ;;  %v1218_v24 = vmul.f32 %v1216_v6, %v1214_v22 }
 0x12d   : >> { %v1225_v3 = vmax.f32 %v1223_v63, 0.0  ;;  %v1226_v61 = vmax.f32 %v1224_v53, 0.0  ;;  %v1235_v30 = vadd.f32 %v1234_v25, %v2996_v7  ;;  %v1236_v59 = vadd.f32 %v1234_v25, %v2998_v52 }
 0x12e   : >> { %v1219_v0 = vadd.f32 %v1217_v18, %v1207_v46  ;;  %v1220_v37 = vadd.f32 %v1218_v24, %v1208_v56  ;;  %v1240_v42 = vstv %s3030_s25  ;;  %v1246_v28 = vstv %s3032_s8 }
 0x12f   : >> { %v1229_v31 = vmul.f32 %v1228_v48, %v1225_v3  ;;  %v1230_v34 = vmul.f32 %v1228_v48, %v1226_v61  ;;  %v1237_v54 = vmax.f32 %v1235_v30, 0.0  ;;  %v1238_v4 = vmax.f32 %v1236_v59, 0.0 }
 0x130   : >> { %v1247_v36 = vadd.f32 %v1246_v28, %v3000_v27  ;;  %v1248_v57 = vadd.f32 %v1246_v28, %v3002_v35  ;;  %v1252_v13 = vstv %s3036_s16  ;;  %v1258_v58 = vstv %s1257_s17 }
 0x131   : >> { %v1231_v55 = vadd.f32 %v1229_v31, %v1219_v0  ;;  %v1232_v7 = vadd.f32 %v1230_v34, %v1220_v37  ;;  %v1241_v10 = vmul.f32 %v1240_v42, %v1237_v54  ;;  %v1242_v52 = vmul.f32 %v1240_v42, %v1238_v4 }
 0x132   : >> { %v1249_v1 = vmax.f32 %v1247_v36, 0.0  ;;  %v1250_v19 = vmax.f32 %v1248_v57, 0.0 }
 0x133   : >> { %v1243_v32 = vadd.f32 %v1241_v10, %v1231_v55  ;;  %v1244_v29 = vadd.f32 %v1242_v52, %v1232_v7 }
 0x134   : >> { %v1253_v16 = vmul.f32 %v1252_v13, %v1249_v1  ;;  %v1254_v60 = vmul.f32 %v1252_v13, %v1250_v19  ;;  %387 = sbr.rel (!%p385_p13) target bundleno = 122 (0x7a), region = 137 }
 0x136   : >> { %v1255_v26 = vadd.f32 %v1253_v16, %v1243_v32  ;;  %v1256_v50 = vadd.f32 %v1254_v60, %v1244_v29 }
 0x138   : >> { %v1259_v27 = vadd.f32 %v1258_v58, %v1255_v26  ;;  %v1260_v62 = vadd.f32 %v1258_v58, %v1256_v50 }
 0x13a   : >> { %1263 = vst [vmem:[%s1262_s20] sm:$0xff] %v1259_v27  ;;  %1264 = vst [vmem:[%s1262_s20 + $0x8] sm:$0xff] %v1260_v62 }
 0x13b PF: > { %p18_p0 = scmp.ge.s32.totalorder %s1846_s29, 4   ;;  %s3091_s26 = smov %s1771_s27 }
 0x13c   : > { %s3092_s27 = smov %s1856_s9  ;;  %s3093_s28 = smov %s1846_s29 }
 0x13d   :  { %20 = sbr.rel (!%p18_p0) target bundleno = 7 (0x7), region = 148 }
 0x144   :  { %1289 = vsyncpa [#allocation5], 1 }
 0x145   :  { %1291 = vsyncpa [#allocation5 + $0x1], 1 }
 0x146   :  { %1292 = vsyncpa [#allocation7], 1 }
 0x147   :  { %1293 = vsyncpa [#allocation10], 1 }

</bundles_post_ra>
